<compile_context>
chip_gen: v7x
topology: tpu7x:2x2x1
jax: 0.10.0
libtpu: 0.0.40
codegen_flags: <defaults>
</compile_context>

<pallas_src>
import jax
import jax.numpy as jnp
from jax.experimental import pallas as pl
from jax.experimental.pallas import tpu as pltpu


def _convt_gemm_kernel(w_ref, b_ref, x_ref, o_ref):
    # w_ref: (Nout, Cin)   b_ref: (Nout, 1)
    # x_ref: (Cin, hw_tile)   o_ref: (Nout, hw_tile)   (leading batch dim squeezed)
    acc = jnp.dot(w_ref[...], x_ref[...],
                  preferred_element_type=jnp.float32,
                  precision=jax.lax.Precision.HIGHEST)
    acc = acc + b_ref[...]                              # broadcast (Nout,1) over lanes
    o_ref[...] = jnp.where(acc > 0, acc, acc * 0.5)     # fused torch.where(x>0, x, 0.5*x)


def _pick_hw_tile(hw_padded, n_batch, cin, nout, vmem_budget_bytes=24 * 1024 * 1024):
    """Largest multiple-of-128 tile dividing hw_padded that fits the VMEM budget
    (double-buffered f32 x-tile + out-tile), capped, keeping >=2 total grid steps
    when possible so v7x can use both TensorCores."""
    bytes_per_lane = 2 * 4 * (cin + nout)                    # 2x buffers, f32, in + out
    cap = (vmem_budget_bytes // bytes_per_lane) // 128 * 128  # budget-derived lane width
    cap = max(128, min(cap, 4096))
    if n_batch == 1 and hw_padded >= 256:
        # force >=2 hw tiles so a single-image call still spans 2 TensorCores on v7x
        cap = min(cap, max(128, (hw_padded // 2) // 128 * 128))
    tile = min(cap, hw_padded)
    while hw_padded % tile != 0:      # hw_padded is a multiple of 128 -> terminates at 128
        tile -= 128
    return tile


def conv_transpose_leaky(x, weight, bias, *, stride=2, padding=1):
    """x: (N, Cin, H, W) f32. weight: (Cin, Cout, KH, KW). bias: (Cout,). Returns NCHW f32."""
    N, Cin, H, W = x.shape
    Cin_w, Cout, KH, KW = weight.shape
    assert Cin == Cin_w
    assert stride == KH == KW == 2 and padding == 1     # non-overlapping case

    HW = H * W
    Nout = Cout * KH * KW

    # --- glue (layout only, no compute) -------------------------------------
    x3 = x.reshape(N, Cin, HW)                                   # free on contiguous NCHW
    hw_padded = ((HW + 127) // 128) * 128                        # lane-align HW
    if hw_padded != HW:
        x3 = jnp.pad(x3, ((0, 0), (0, 0), (0, hw_padded - HW)))
    wt = jnp.transpose(weight.reshape(Cin, Nout), (1, 0))        # (Nout, Cin), tiny
    bias_full = jnp.repeat(bias, KH * KW).reshape(Nout, 1)       # (Nout, 1), matches o*4+kh*2+kw

    hw_tile = _pick_hw_tile(hw_padded, N, Cin, Nout)
    n_hw = hw_padded // hw_tile

    # Explicit scoped-VMEM limit with headroom (stays under v7x's 64 MiB physical).
    vmem_need = 2 * 4 * (Cin + Nout) * hw_tile + 2 * 4 * (Nout * Cin + Nout)
    vmem_limit = int(min(64 * 1024 * 1024, max(32 * 1024 * 1024, 2 * vmem_need)))

    cost = pl.CostEstimate(
        flops=2 * N * hw_padded * Cin * Nout,
        transcendentals=0,
        bytes_accessed=4 * (N * Cin * hw_padded + Nout * Cin + Nout + N * Nout * hw_padded),
    )

    out_mat = pl.pallas_call(
        _convt_gemm_kernel,
        out_shape=jax.ShapeDtypeStruct((N, Nout, hw_padded), jnp.float32),
        grid=(N, n_hw),
        in_specs=[
            pl.BlockSpec((Nout, Cin), lambda n, t: (0, 0)),                       # weight (resident)
            pl.BlockSpec((Nout, 1), lambda n, t: (0, 0)),                         # bias   (resident)
            pl.BlockSpec((pl.Squeezed(), Cin, hw_tile), lambda n, t: (n, 0, t)),  # x tile
        ],
        out_specs=pl.BlockSpec((pl.Squeezed(), Nout, hw_tile), lambda n, t: (n, 0, t)),
        compiler_params=pltpu.CompilerParams(
            dimension_semantics=("parallel", "parallel"),
            vmem_limit_bytes=vmem_limit,
        ),
        cost_estimate=cost,
    )(wt, bias_full, x3)

    if hw_padded != HW:
        out_mat = out_mat[:, :, :HW]

    # --- glue: pixel-shuffle scatter + crop (pure layout) --------------------
    # Contiguous reshape is a metadata no-op; transpose + crop fuse into one XLA copy.
    y = out_mat.reshape(N, Cout, KH, KW, H, W)
    y = jnp.transpose(y, (0, 1, 4, 2, 5, 3)).reshape(N, Cout, H * KH, W * KW)
    # ConvTranspose2d padding=1 crops 1 pixel from each spatial edge of the full output.
    y = y[:, :, padding:H * KH - padding, padding:W * KW - padding]
    return y  # (N, Cout, 2H-2, 2W-2)


if __name__ == "__main__":
    key = jax.random.PRNGKey(0)
    k_x, k_w, k_b = jax.random.split(key, 3)

    # Shapes consistent with the module: Cin = int(480*7/8 + 0.5) = 420, Cout = 7,
    # kernel 2, stride 2, padding 1.  Spatial 16x16 (as in the spec), small batch.
    N, Cin, H, W = 2, int(480 * 7 / 8 + 0.5), 16, 16
    Cout, KH, KW = 7, 2, 2

    x = jax.random.normal(k_x, (N, Cin, H, W), dtype=jnp.float32)

    # PyTorch ConvTranspose2d default init: fan_in = weight.size(1)*KH*KW = Cout*KH*KW.
    fan_in = Cout * KH * KW
    bound = 1.0 / (fan_in ** 0.5)
    weight = jax.random.uniform(k_w, (Cin, Cout, KH, KW), jnp.float32, -bound, bound)
    bias = jax.random.uniform(k_b, (Cout,), jnp.float32, -bound, bound)

    out = conv_transpose_leaky(x, weight, bias, stride=2, padding=1)
    out = jax.block_until_ready(out)
    assert out.shape == (N, Cout, 2 * H - 2, 2 * W - 2), out.shape

    # Pure-JAX reference (same math, highest-precision einsum) for a sanity check.
    ref_full = jnp.einsum("nchw,cokl->nohkwl", x, weight,
                          precision=jax.lax.Precision.HIGHEST)
    ref_full = ref_full.reshape(N, Cout, H * KH, W * KW) + bias[None, :, None, None]
    ref = ref_full[:, :, 1:H * KH - 1, 1:W * KW - 1]
    ref = jnp.where(ref > 0, ref, 0.5 * ref)
    assert jnp.allclose(out, ref, rtol=1e-3, atol=5e-3), float(jnp.max(jnp.abs(out - ref)))

    print("KERNEL_OK")
</pallas_src>

<mosaic_0001>
module attributes {stable_mosaic.version = 11 : i64} {
  func.func @_convt_gemm_kernel(%arg0: i32, %arg1: i32, %arg2: memref<28x420xf32, #tpu.memory_space<vmem>>, %arg3: memref<28x1xf32, #tpu.memory_space<vmem>>, %arg4: memref<1x420x256xf32, #tpu.memory_space<vmem>>, %arg5: memref<1x28x256xf32, #tpu.memory_space<vmem>>) attributes {dimension_semantics = [#tpu.dimension_semantics<parallel>, #tpu.dimension_semantics<parallel>], iteration_bounds = array<i64: 2, 1>, scalar_prefetch = 0 : i64, scratch_operands = 0 : i64, tpu.core_type = #tpu.core_type<tc>, window_params = [{pipeline_mode = #tpu.pipeline_mode<synchronous>, transform_indices = @transform_0, window_bounds = array<i64: 28, 420>}, {pipeline_mode = #tpu.pipeline_mode<synchronous>, transform_indices = @transform_1, window_bounds = array<i64: 28, 1>}, {transform_indices = @transform_2, window_bounds = array<i64: 1, 420, 256>}, {transform_indices = @transform_3, window_bounds = array<i64: 1, 28, 256>}]} {
    %c0 = arith.constant 0 : index
    %c0_0 = arith.constant 0 : index
    %0 = vector.load %arg2[%c0, %c0_0] : memref<28x420xf32, #tpu.memory_space<vmem>>, vector<28x420xf32>
    %c0_1 = arith.constant 0 : index
    %c0_2 = arith.constant 0 : index
    %c0_3 = arith.constant 0 : index
    %1 = vector.load %arg4[%c0_1, %c0_2, %c0_3] : memref<1x420x256xf32, #tpu.memory_space<vmem>>, vector<1x420x256xf32>
    %2 = vector.shape_cast %1 : vector<1x420x256xf32> to vector<420x256xf32>
    %cst = arith.constant dense<0.000000e+00> : vector<28x256xf32>
    %3 = tpu.matmul %0, %2, %cst {dimension_numbers = #tpu.dot_dimension_numbers<[1], [0], [0], [1], [0, 0, 1, 1], [], []>, precision = #tpu.contract_precision<fp32>} : vector<28x420xf32>, vector<420x256xf32>, vector<28x256xf32> -> vector<28x256xf32>
    %c0_4 = arith.constant 0 : index
    %c0_5 = arith.constant 0 : index
    %4 = vector.load %arg3[%c0_4, %c0_5] : memref<28x1xf32, #tpu.memory_space<vmem>>, vector<28x1xf32>
    %5 = vector.broadcast %4 : vector<28x1xf32> to vector<28x256xf32>
    %6 = arith.addf %3, %5 : vector<28x256xf32>
    %cst_6 = arith.constant 0.000000e+00 : f32
    %7 = vector.broadcast %cst_6 : f32 to vector<28x256xf32>
    %8 = arith.cmpf ogt, %6, %7 : vector<28x256xf32>
    %cst_7 = arith.constant 5.000000e-01 : f32
    %9 = vector.broadcast %cst_7 : f32 to vector<28x256xf32>
    %10 = arith.mulf %6, %9 : vector<28x256xf32>
    %11 = arith.select %8, %6, %10 : vector<28x256xi1>, vector<28x256xf32>
    %c0_8 = arith.constant 0 : index
    %c0_9 = arith.constant 0 : index
    %c0_10 = arith.constant 0 : index
    %12 = vector.load %arg5[%c0_8, %c0_9, %c0_10] : memref<1x28x256xf32, #tpu.memory_space<vmem>>, vector<1x28x256xf32>
    %13 = vector.shape_cast %12 : vector<1x28x256xf32> to vector<28x256xf32>
    %14 = vector.shape_cast %11 : vector<28x256xf32> to vector<1x28x256xf32>
    tpu.vector_store %arg5[%c0_8, %c0_9, %c0_10], %14 {strides = array<i32>} : memref<1x28x256xf32, #tpu.memory_space<vmem>>, vector<1x28x256xf32>,
    return
  }
  func.func @transform_0(%arg0: i32, %arg1: i32) -> (i32, i32) {
    %c0_i32 = arith.constant 0 : i32
    %c0_i32_0 = arith.constant 0 : i32
    %c0_i32_1 = arith.constant 0 : i32
    return %c0_i32, %c0_i32_0 : i32, i32
  }
  func.func @transform_1(%arg0: i32, %arg1: i32) -> (i32, i32) {
    %c0_i32 = arith.constant 0 : i32
    %c0_i32_0 = arith.constant 0 : i32
    %c0_i32_1 = arith.constant 0 : i32
    return %c0_i32, %c0_i32_0 : i32, i32
  }
  func.func @transform_2(%arg0: i32, %arg1: i32) -> (i32, i32, i32) {
    %c0_i32 = arith.constant 0 : i32
    %c0_i32_0 = arith.constant 0 : i32
    return %arg0, %c0_i32, %arg1 : i32, i32, i32
  }
  func.func @transform_3(%arg0: i32, %arg1: i32) -> (i32, i32, i32) {
    %c0_i32 = arith.constant 0 : i32
    %c0_i32_0 = arith.constant 0 : i32
    return %arg0, %c0_i32, %arg1 : i32, i32, i32
  }
}

</mosaic_0001>

<bundles_post_ra>
// kernel: tpu_custom_call.1
= control target key start
LH: loop header
LB: loop body
LE: loop exit
PB: predicated region body
PF: predicated region fallthrough
CT: control target
= control target key end

     0   :  { %s3957_s12 = smov 0   ;;  %s3959_s13 = smov 0   ;;  %s5764_s0 = inlined_call_operand.vmem [shape: f32[28,420], index: 0, kind: input, shape index: {}]   ;;  %s5765_s1 = inlined_call_operand.vmem [shape: f32[28,1], index: 1, kind: input, shape index: {}]   ;;  %s5766_s2 = inlined_call_operand.vmem [shape: f32[2,420,256], index: 2, kind: input, shape index: {}]   ;;  %s5767_s3 = inlined_call_operand.vmem [shape: f32[2,28,256], index: 3, kind: output, shape index: {}]  }
   0x1   :  { %s3961_s14 = smov 0  }
   0x2 LB: > { %s25_s15 = sadd.s32 1, %s3930_s13  ;;  %p3153_p0 = scmp.ge.s32.totalorder %s3934_s14, 1  ;;  %s3934_s14 = sphi %s3961_s14, %s13_s14   ;;  %s3930_s13 = sphi %s3959_s13, %s6775_s13   ;;  %s3926_s12 = sphi %s3957_s12, %s6774_s12  }
   0x3   : > { %p27_p1 = scmp.ge.s32.totalorder %s25_s15, 2  ;;  %p158_p2 = scmp.lt.s32.totalorder %s3934_s14, 3 }
   0x5   : > { %s6777_s15 = smov (%p27_p1, %s25_s15), 0  ;;  %p159_p3 = pnand %p3153_p0, %p158_p2 }
   0x7   : > { %162 = sbr.rel (%p159_p3) target bundleno = 617 (0x269), region = 32 }
   0xe   : > { %p191_p4 = scmp.lt.s32.totalorder %s3926_s12, 1  ;;  %v211_v0 = vld [vmem:[%s5764_s0 + $0x8] sm:$0xff]  ;;  %v210_v1 = vld [vmem:[%s5764_s0] sm:$0xff]  ;;  %vm356_vm0 = vcmask 293888   ;;  %v213_v13 = vld [vmem:[%s5764_s0 + $0x18] sm:$0xff]  ;;  %vm369_vm1 = vcmask 1043456  }
   0xf   : > { %v215_v2 = vld [vmem:[%s5764_s0 + $0x28] sm:$0xff]  ;;  %v3984_v3 = vand.u32 4294901760, %v211_v0  ;;  %v3986_v4 = vand.u32 4294901760, %v210_v1  ;;  %v214_v6 = vld [vmem:[%s5764_s0 + $0x20] sm:$0xff]  ;;  %v212_v14 = vld [vmem:[%s5764_s0 + $0x10] sm:$0xff]  ;;  %v358_v17 = vsel %vm356_vm0, %v213_v13, 0 }
  0x10   : > { %v3988_v5 = vand.u32 4294901760, %v215_v2  ;;  %s6779_s12 = smov (!%p191_p4, %s3926_s12), 1  ;;  %v219_v7 = vld [vmem:[%s5764_s0 + $0x48] sm:$0xff]  ;;  %v218_v8 = vld [vmem:[%s5764_s0 + $0x40] sm:$0xff]  ;;  %v4024_v16 = vand.u32 4294901760, %v214_v6  ;;  %v4027_v18 = vand.u32 4294901760, %v212_v14 }
  0x11   : > { %6173 = vst [vmem:[#allocation2_spill] sm:$0xff] %v3984_v3  ;;  %6174 = vst [vmem:[#allocation3_spill] sm:$0xff] %v3986_v4  ;;  %v223_v9 = vld [vmem:[%s5764_s0 + $0x68] sm:$0xf]  ;;  %v4005_v10 = vsub.f32 %v211_v0, %v3984_v3  ;;  %1814 = vmatprep.mubr.f32.mxu0 %v3984_v3  ;;  %v4009_v11 = vsub.f32 %v210_v1, %v3986_v4  ;;  %v222_v12 = vld [vmem:[%s5764_s0 + $0x60] sm:$0xf] }
  0x12   : > { %6175 = vst [vmem:[#allocation4_spill] sm:$0xff] %v3988_v5  ;;  %v4021_v15 = vsub.f32 %v215_v2, %v3988_v5  ;;  %s3880_s9 = smul.u32 848, %s6779_s12  ;;  %6179 = vst [vmem:[#allocation8_spill] sm:$0xff] %v4024_v16  ;;  %v4031_v21 = vand.u32 4294901760, %v358_v17  ;;  %v4039_v23 = vand.u32 4294901760, %v219_v7  ;;  %v4041_v24 = vand.u32 4294901760, %v218_v8 }
  0x13   : > { %6176 = vst [vmem:[#allocation5_spill] sm:$0xff] %v4005_v10  ;;  %6177 = vst [vmem:[#allocation6_spill] sm:$0xff] %v4009_v11  ;;  %v5770_v19 = vand.u32 4294901760, %v4005_v10  ;;  %v5769_v20 = vand.u32 4294901760, %v4009_v11  ;;  %v4043_v25 = vand.u32 4294901760, %v223_v9  ;;  %v4045_v26 = vand.u32 4294901760, %v222_v12 }
  0x14   : > { %6178 = vst [vmem:[#allocation7_spill] sm:$0xff] %v4021_v15  ;;  %6180 = vst [vmem:[#allocation9_spill] sm:$0xff] %v4027_v18  ;;  %v5768_v22 = vand.u32 4294901760, %v4021_v15  ;;  %s4037_s16 = scalar_lea.vmem %s5766_s2, %s3880_s9  ;;  %v4061_v32 = vsub.f32 %v212_v14, %v4027_v18  ;;  %v4064_v33 = vsub.f32 %v214_v6, %v4024_v16  ;;  %v4070_v40 = vsub.f32 %v358_v17, %v4031_v21  ;;  %s3159_s22 = sshll.u32 %s6779_s12, 6 }
  0x15   : > { %6181 = vst [vmem:[#allocation10_spill] sm:$0xff] %v4031_v21  ;;  %6182 = vst [vmem:[#allocation11_spill] sm:$0xff] %v4039_v23  ;;  %v227_v27 = vld [vmem:[%s4037_s16 + $0x8] sm:$0xff]  ;;  %v229_v28 = vld [vmem:[%s4037_s16 + $0x18] sm:$0xff]  ;;  %v4053_v30 = vsub.f32 %v4005_v10, %v5770_v19  ;;  %v4058_v31 = vsub.f32 %v4009_v11, %v5769_v20  ;;  %s5745_s25 = scalar_lea.vmem %s5767_s3, %s3159_s22 }
  0x16   : > { %6183 = vst [vmem:[#allocation12_spill] sm:$0xff] %v4041_v24  ;;  %6184 = vst [vmem:[#allocation13_spill] sm:$0xff] %v4043_v25  ;;  %v226_v29 = vld [vmem:[%s4037_s16] sm:$0xff]  ;;  %v376_v34 = vand.u32 4294901760, %v227_v27  ;;  %v380_v35 = vand.u32 4294901760, %v229_v28  ;;  %v228_v36 = vld [vmem:[%s4037_s16 + $0x10] sm:$0xff]  ;;  %v4078_v47 = vsub.f32 %v4021_v15, %v5768_v22 }
  0x17   : > { %6185 = vst [vmem:[#allocation14_spill] sm:$0xff] %v4045_v26  ;;  %6186 = vst [vmem:[#allocation15_spill] sm:$0xff] %v4061_v32  ;;  %v378_v37 = vand.u32 4294901760, %v226_v29  ;;  %v231_v38 = vld [vmem:[%s4037_s16 + $0x28] sm:$0xff]  ;;  %v233_v39 = vld [vmem:[%s4037_s16 + $0x38] sm:$0xff]  ;;  %v382_v41 = vand.u32 4294901760, %v228_v36 }
  0x18   : > { %6187 = vst [vmem:[#allocation16_spill] sm:$0xff] %v4064_v33  ;;  %6188 = vst [vmem:[#allocation17_spill] sm:$0xff] %v4070_v40  ;;  %v384_v42 = vand.u32 4294901760, %v231_v38  ;;  %v388_v43 = vand.u32 4294901760, %v233_v39  ;;  %v230_v44 = vld [vmem:[%s4037_s16 + $0x20] sm:$0xff]  ;;  %v232_v45 = vld [vmem:[%s4037_s16 + $0x30] sm:$0xff]  ;;  %v4080_v48 = vpack.c.bf16 %v380_v35, %v376_v34  ;;  %v4082_v49 = vsub.f32 %v227_v27, %v376_v34 }
  0x19   : > { %v235_v46 = vld [vmem:[%s4037_s16 + $0x48] sm:$0xff]  ;;  %6189 = vst [vmem:[#allocation18_spill] sm:$0xff] %v4078_v47  ;;  %v4084_v50 = vsub.f32 %v229_v28, %v380_v35  ;;  %v4086_v51 = vsub.f32 %v226_v29, %v378_v37  ;;  %v237_v52 = vld [vmem:[%s4037_s16 + $0x58] sm:$0xff]  ;;  %v234_v53 = vld [vmem:[%s4037_s16 + $0x40] sm:$0xff]  ;;  %v4091_v55 = vpack.c.bf16 %v382_v41, %v378_v37  ;;  %v4093_v56 = vsub.f32 %v228_v36, %v382_v41 }
  0x1a   : > { %6190 = vst [vmem:[#allocation19_spill] sm:$0xff] %v4080_v48  ;;  %6191 = vst [vmem:[#allocation20_spill] sm:$0xff] %v4082_v49  ;;  %v236_v54 = vld [vmem:[%s4037_s16 + $0x50] sm:$0xff]  ;;  %v4095_v57 = vpack.c.bf16 %v388_v43, %v384_v42  ;;  %v4097_v58 = vsub.f32 %v231_v38, %v384_v42  ;;  %v239_v59 = vld [vmem:[%s4037_s16 + $0x68] sm:$0xff]  ;;  %3161 = vmatprep.subr.bf16.mxu1 %v4080_v48  ;;  %3481 = vmatprep.subr.bf16.mxu0 %v4080_v48  ;;  %v386_v62 = vand.u32 4294901760, %v230_v44 }
  0x1b   : > { %6192 = vst [vmem:[#allocation21_spill] sm:$0xff] %v4084_v50  ;;  %6193 = vst [vmem:[#allocation22_spill] sm:$0xff] %v4086_v51  ;;  %v241_v60 = vld [vmem:[%s4037_s16 + $0x78] sm:$0xff]  ;;  %v4103_v61 = vsub.f32 %v233_v39, %v388_v43  ;;  %v390_v63 = vand.u32 4294901760, %v232_v45  ;;  %v392_v0 = vand.u32 4294901760, %v235_v46  ;;  %3163 = vmatpush1.bf16.msra.mxu1 %v4091_v55  ;;  %3483 = vmatpush1.bf16.msra.mxu0 %v4091_v55  ;;  %v396_v1 = vand.u32 4294901760, %v237_v52 }
  0x1c   : > { %6194 = vst [vmem:[#allocation23_spill] sm:$0xff] %v4091_v55  ;;  %6195 = vst [vmem:[#allocation24_spill] sm:$0xff] %v4093_v56  ;;  %v394_v2 = vand.u32 4294901760, %v234_v53  ;;  %v398_v6 = vand.u32 4294901760, %v236_v54  ;;  %v400_v7 = vand.u32 4294901760, %v239_v59  ;;  %v238_v8 = vld [vmem:[%s4037_s16 + $0x60] sm:$0xff]  ;;  %3165 = vmatprep.subr.bf16.mxu1 %v4095_v57  ;;  %3485 = vmatprep.subr.bf16.mxu0 %v4095_v57  ;;  %v4112_v12 = vsub.f32 %v230_v44, %v386_v62 }
  0x1d   : > { %6196 = vst [vmem:[#allocation25_spill] sm:$0xff] %v4095_v57  ;;  %6197 = vst [vmem:[#allocation26_spill] sm:$0xff] %v4097_v58  ;;  %v4110_v9 = vpack.c.bf16 %v390_v63, %v386_v62  ;;  %v4114_v13 = vsub.f32 %v232_v45, %v390_v63  ;;  %v404_v14 = vand.u32 4294901760, %v241_v60  ;;  %v240_v17 = vld [vmem:[%s4037_s16 + $0x70] sm:$0xff]  ;;  %v243_v27 = vld [vmem:[%s4037_s16 + $0x88] sm:$0xff]  ;;  %v4119_v29 = vpack.c.bf16 %v396_v1, %v392_v0 }
  0x1e   : > { %6198 = vst [vmem:[#allocation27_spill] sm:$0xff] %v4103_v61  ;;  %6200 = vst [vmem:[#allocation29_spill] sm:$0xff] %v4112_v12  ;;  %v245_v28 = vld [vmem:[%s4037_s16 + $0x98] sm:$0xff]  ;;  %v4121_v34 = vsub.f32 %v235_v46, %v392_v0  ;;  %v4123_v35 = vsub.f32 %v237_v52, %v396_v1  ;;  %v4125_v36 = vpack.c.bf16 %v398_v6, %v394_v2  ;;  %v242_v37 = vld [vmem:[%s4037_s16 + $0x80] sm:$0xff]  ;;  %v402_v46 = vand.u32 4294901760, %v238_v8 }
  0x1f   : > { %6199 = vst [vmem:[#allocation28_spill] sm:$0xff] %v4110_v9  ;;  %6201 = vst [vmem:[#allocation30_spill] sm:$0xff] %v4114_v13  ;;  %v244_v38 = vld [vmem:[%s4037_s16 + $0x90] sm:$0xff]  ;;  %v247_v39 = vld [vmem:[%s4037_s16 + $0xa8] sm:$0xff]  ;;  %v4130_v41 = vsub.f32 %v234_v53, %v394_v2  ;;  %v4132_v42 = vsub.f32 %v236_v54, %v398_v6  ;;  %v4134_v43 = vpack.c.bf16 %v404_v14, %v400_v7  ;;  %3167 = vmatpush1.bf16.msra.mxu1 %v4110_v9 }
  0x20   : > { %6202 = vst [vmem:[#allocation31_spill] sm:$0xff] %v4119_v29  ;;  %6203 = vst [vmem:[#allocation32_spill] sm:$0xff] %v4121_v34  ;;  %v4136_v44 = vsub.f32 %v239_v59, %v400_v7  ;;  %3487 = vmatpush1.bf16.msra.mxu0 %v4110_v9  ;;  %v4140_v45 = vsub.f32 %v241_v60, %v404_v14  ;;  %v406_v52 = vand.u32 4294901760, %v240_v17  ;;  %v408_v53 = vand.u32 4294901760, %v243_v27  ;;  %v249_v54 = vld [vmem:[%s4037_s16 + $0xb8] sm:$0xff]  ;;  %v246_v1 = vld [vmem:[%s4037_s16 + $0xa0] sm:$0xff] }
  0x21   : > { %6204 = vst [vmem:[#allocation33_spill] sm:$0xff] %v4123_v35  ;;  %6205 = vst [vmem:[#allocation34_spill] sm:$0xff] %v4125_v36  ;;  %3169 = vmatprep.subr.bf16.mxu1 %v4119_v29  ;;  %3489 = vmatprep.subr.bf16.mxu0 %v4119_v29  ;;  %v412_v62 = vand.u32 4294901760, %v245_v28  ;;  %v410_v59 = vand.u32 4294901760, %v242_v37  ;;  %v414_v63 = vand.u32 4294901760, %v244_v38  ;;  %v416_v0 = vand.u32 4294901760, %v247_v39 }
  0x22   : > { %6206 = vst [vmem:[#allocation35_spill] sm:$0xff] %v4130_v41  ;;  %6207 = vst [vmem:[#allocation36_spill] sm:$0xff] %v4132_v42  ;;  %v248_v2 = vld [vmem:[%s4037_s16 + $0xb0] sm:$0xff]  ;;  %v4147_v60 = vpack.c.bf16 %v406_v52, %v402_v46  ;;  %v4149_v6 = vsub.f32 %v238_v8, %v402_v46  ;;  %v4151_v7 = vsub.f32 %v240_v17, %v406_v52  ;;  %v251_v22 = vld [vmem:[%s4037_s16 + $0xc8] sm:$0xff]  ;;  %v420_v17 = vand.u32 4294901760, %v249_v54 }
  0x23   : > { %6208 = vst [vmem:[#allocation37_spill] sm:$0xff] %v4134_v43  ;;  %6209 = vst [vmem:[#allocation38_spill] sm:$0xff] %v4136_v44  ;;  %v4153_v14 = vsub.f32 %v243_v27, %v408_v53  ;;  %v253_v20 = vld [vmem:[%s4037_s16 + $0xd8] sm:$0xff]  ;;  %v250_v19 = vld [vmem:[%s4037_s16 + $0xc0] sm:$0xff]  ;;  %v4158_v9 = vpack.c.bf16 %v412_v62, %v408_v53  ;;  %v4160_v29 = vsub.f32 %v245_v28, %v412_v62  ;;  %3171 = vmatpush1.bf16.msra.mxu1 %v4125_v36 }
  0x24   : > { %6210 = vst [vmem:[#allocation39_spill] sm:$0xff] %v4140_v45  ;;  %6211 = vst [vmem:[#allocation40_spill] sm:$0xff] %v4147_v60  ;;  %v4162_v57 = vpack.c.bf16 %v414_v63, %v410_v59  ;;  %v4164_v15 = vsub.f32 %v242_v37, %v410_v59  ;;  %v252_v55 = vld [vmem:[%s4037_s16 + $0xd0] sm:$0xff]  ;;  %3491 = vmatpush1.bf16.msra.mxu0 %v4125_v36  ;;  %v4169_v8 = vsub.f32 %v244_v38, %v414_v63  ;;  %v255_v62 = vld [vmem:[%s4037_s16 + $0xe8] sm:$0xff] }
  0x25   : > { %6212 = vst [vmem:[#allocation41_spill] sm:$0xff] %v4149_v6  ;;  %6213 = vst [vmem:[#allocation42_spill] sm:$0xff] %v4151_v7  ;;  %v4171_v27 = vsub.f32 %v247_v39, %v416_v0  ;;  %v418_v28 = vand.u32 4294901760, %v246_v1  ;;  %3173 = vmatprep.subr.bf16.mxu1 %v4134_v43  ;;  %3493 = vmatprep.subr.bf16.mxu0 %v4134_v43  ;;  %v422_v37 = vand.u32 4294901760, %v248_v2  ;;  %v424_v46 = vand.u32 4294901760, %v251_v22  ;;  %v257_v36 = vld [vmem:[%s4037_s16 + $0xf8] sm:$0xff] }
  0x26   : > { %6214 = vst [vmem:[#allocation43_spill] sm:$0xff] %v4153_v14  ;;  %6215 = vst [vmem:[#allocation44_spill] sm:$0xff] %v4158_v9  ;;  %v428_v52 = vand.u32 4294901760, %v253_v20  ;;  %v426_v53 = vand.u32 4294901760, %v250_v19  ;;  %v4176_v38 = vpack.c.bf16 %v420_v17, %v416_v0  ;;  %v4178_v59 = vsub.f32 %v249_v54, %v420_v17  ;;  %v254_v11 = vld [vmem:[%s4037_s16 + $0xe0] sm:$0xff]  ;;  %v256_v48 = vld [vmem:[%s4037_s16 + $0xf0] sm:$0xff] }
  0x27   : > { %6216 = vst [vmem:[#allocation45_spill] sm:$0xff] %v4160_v29  ;;  %6217 = vst [vmem:[#allocation46_spill] sm:$0xff] %v4162_v57  ;;  %v4180_v63 = vsub.f32 %v246_v1, %v418_v28  ;;  %v430_v39 = vand.u32 4294901760, %v252_v55  ;;  %v4185_v18 = vpack.c.bf16 %v422_v37, %v418_v28  ;;  %v4187_v43 = vsub.f32 %v248_v2, %v422_v37  ;;  %v259_v3 = vld [vmem:[%s4037_s16 + $0x108] sm:$0xff]  ;;  %v261_v0 = vld [vmem:[%s4037_s16 + $0x118] sm:$0xff] }
  0x28   : > { %6218 = vst [vmem:[#allocation47_spill] sm:$0xff] %v4164_v15  ;;  %6219 = vst [vmem:[#allocation48_spill] sm:$0xff] %v4169_v8  ;;  %v4189_v21 = vpack.c.bf16 %v428_v52, %v424_v46  ;;  %v4191_v10 = vsub.f32 %v251_v22, %v424_v46  ;;  %v258_v33 = vld [vmem:[%s4037_s16 + $0x100] sm:$0xff]  ;;  %3175 = vmatpush1.bf16.msra.mxu1 %v4147_v60  ;;  %3495 = vmatpush1.bf16.msra.mxu0 %v4147_v60  ;;  %v432_v17 = vand.u32 4294901760, %v255_v62  ;;  %v260_v60 = vld [vmem:[%s4037_s16 + $0x110] sm:$0xff] }
  0x29   : > { %6220 = vst [vmem:[#allocation49_spill] sm:$0xff] %v4171_v27  ;;  %6221 = vst [vmem:[#allocation50_spill] sm:$0xff] %v4176_v38  ;;  %v4198_v54 = vsub.f32 %v253_v20, %v428_v52  ;;  %v4200_v1 = vpack.c.bf16 %v430_v39, %v426_v53  ;;  %v4202_v2 = vsub.f32 %v250_v19, %v426_v53  ;;  %3177 = vmatprep.subr.bf16.mxu1 %v4158_v9  ;;  %v263_v53 = vld [vmem:[%s4037_s16 + $0x128] sm:$0xff]  ;;  %v265_v32 = vld [vmem:[%s4037_s16 + $0x138] sm:$0xff] }
  0x2a   : > { %6222 = vst [vmem:[#allocation51_spill] sm:$0xff] %v4178_v59  ;;  %6223 = vst [vmem:[#allocation52_spill] sm:$0xff] %v4180_v63  ;;  %3497 = vmatprep.subr.bf16.mxu0 %v4158_v9  ;;  %v4206_v22 = vsub.f32 %v252_v55, %v430_v39  ;;  %v436_v28 = vand.u32 4294901760, %v257_v36  ;;  %v434_v37 = vand.u32 4294901760, %v254_v11  ;;  %v438_v46 = vand.u32 4294901760, %v256_v48  ;;  %v262_v39 = vld [vmem:[%s4037_s16 + $0x120] sm:$0xff] }
  0x2b   : > { %6224 = vst [vmem:[#allocation53_spill] sm:$0xff] %v4185_v18  ;;  %6225 = vst [vmem:[#allocation54_spill] sm:$0xff] %v4187_v43  ;;  %v4209_v20 = vsub.f32 %v255_v62, %v432_v17  ;;  %v440_v52 = vand.u32 4294901760, %v259_v3  ;;  %v444_v47 = vand.u32 4294901760, %v261_v0  ;;  %v442_v19 = vand.u32 4294901760, %v258_v33  ;;  %v264_v25 = vld [vmem:[%s4037_s16 + $0x130] sm:$0xff] }
  0x2c   : > { %6226 = vst [vmem:[#allocation55_spill] sm:$0xff] %v4189_v21  ;;  %6227 = vst [vmem:[#allocation56_spill] sm:$0xff] %v4191_v10  ;;  %v4213_v40 = vpack.c.bf16 %v436_v28, %v432_v17  ;;  %v4215_v26 = vsub.f32 %v257_v36, %v436_v28  ;;  %v4217_v9 = vpack.c.bf16 %v438_v46, %v434_v37  ;;  %3179 = vmatpush1.bf16.msra.mxu1 %v4162_v57  ;;  %v267_v28 = vld [vmem:[%s4037_s16 + $0x148] sm:$0xff]  ;;  %v282_v23 = vld [vmem:[%s4037_s16 + $0x1c0] sm:$0xff] }
  0x2d   : > { %6228 = vst [vmem:[#allocation57_spill] sm:$0xff] %v4198_v54  ;;  %6229 = vst [vmem:[#allocation58_spill] sm:$0xff] %v4200_v1  ;;  %v4219_v55 = vsub.f32 %v254_v11, %v434_v37  ;;  %3499 = vmatpush1.bf16.msra.mxu0 %v4162_v57  ;;  %v4225_v62 = vsub.f32 %v256_v48, %v438_v46  ;;  %v4229_v17 = vsub.f32 %v259_v3, %v440_v52  ;;  %v269_v57 = vld [vmem:[%s4037_s16 + $0x158] sm:$0xff]  ;;  %v279_v24 = vld [vmem:[%s4037_s16 + $0x1a8] sm:$0xff] }
  0x2e   : > { %6230 = vst [vmem:[#allocation59_spill] sm:$0xff] %v4202_v2  ;;  %6231 = vst [vmem:[#allocation60_spill] sm:$0xff] %v4206_v22  ;;  %v446_v36 = vand.u32 4294901760, %v260_v60  ;;  %3181 = vmatprep.subr.bf16.mxu1 %v4176_v38  ;;  %3501 = vmatprep.subr.bf16.mxu0 %v4176_v38  ;;  %v4234_v11 = vsub.f32 %v261_v0, %v444_v47  ;;  %v4236_v37 = vsub.f32 %v258_v33, %v442_v19  ;;  %v271_v22 = vld [vmem:[%s4037_s16 + $0x168] sm:$0xff]  ;;  %v273_v38 = vld [vmem:[%s4037_s16 + $0x178] sm:$0xff] }
  0x2f   : > { %6232 = vst [vmem:[#allocation61_spill] sm:$0xff] %v4209_v20  ;;  %6233 = vst [vmem:[#allocation62_spill] sm:$0xff] %v4213_v40  ;;  %v4227_v20 = vpack.c.bf16 %v444_v47, %v440_v52  ;;  %v448_v48 = vand.u32 4294901760, %v263_v53  ;;  %v452_v46 = vand.u32 4294901760, %v265_v32  ;;  %v450_v52 = vand.u32 4294901760, %v262_v39  ;;  %v281_v54 = vld [vmem:[%s4037_s16 + $0x1b8] sm:$0xff] }
  0x30   : > { %6234 = vst [vmem:[#allocation63_spill] sm:$0xff] %v4215_v26  ;;  %6235 = vst [vmem:[#allocation64_spill] sm:$0xff] %v4217_v9  ;;  %v4241_v3 = vsub.f32 %v260_v60, %v446_v36  ;;  %v268_v26 = vld [vmem:[%s4037_s16 + $0x150] sm:$0xff]  ;;  %v456_v33 = vand.u32 4294901760, %v267_v28  ;;  %3183 = vmatpush1.bf16.msra.mxu1 %v4185_v18 }
  0x31   : > { %6236 = vst [vmem:[#allocation65_spill] sm:$0xff] %v4219_v55  ;;  %6237 = vst [vmem:[#allocation66_spill] sm:$0xff] %v4225_v62  ;;  %v4239_v62 = vpack.c.bf16 %v446_v36, %v442_v19  ;;  %v266_v55 = vld [vmem:[%s4037_s16 + $0x140] sm:$0xff]  ;;  %v4246_v2 = vpack.c.bf16 %v452_v46, %v448_v48  ;;  %v4248_v47 = vsub.f32 %v263_v53, %v448_v48  ;;  %3503 = vmatpush1.bf16.msra.mxu0 %v4185_v18 }
  0x32   : > { %6238 = vst [vmem:[#allocation67_spill] sm:$0xff] %v4227_v20  ;;  %6239 = vst [vmem:[#allocation68_spill] sm:$0xff] %v4229_v17  ;;  %v454_v17 = vand.u32 4294901760, %v264_v25  ;;  %v4250_v0 = vsub.f32 %v265_v32, %v452_v46  ;;  %v4258_v19 = vsub.f32 %v262_v39, %v450_v52  ;;  %v460_v32 = vand.u32 4294901760, %v269_v57  ;;  %3185 = vmatprep.subr.bf16.mxu1 %v4189_v21 }
  0x33   : > { %6240 = vst [vmem:[#allocation69_spill] sm:$0xff] %v4234_v11  ;;  %6241 = vst [vmem:[#allocation70_spill] sm:$0xff] %v4236_v37  ;;  %v270_v37 = vld [vmem:[%s4037_s16 + $0x160] sm:$0xff]  ;;  %3505 = vmatprep.subr.bf16.mxu0 %v4189_v21  ;;  %v4264_v53 = vsub.f32 %v267_v28, %v456_v33  ;;  %v458_v48 = vand.u32 4294901760, %v266_v55  ;;  %v462_v46 = vand.u32 4294901760, %v268_v26  ;;  %v464_v18 = vand.u32 4294901760, %v271_v22 }
  0x34   : > { %6242 = vst [vmem:[#allocation71_spill] sm:$0xff] %v4239_v62  ;;  %6243 = vst [vmem:[#allocation72_spill] sm:$0xff] %v4241_v3  ;;  %v4256_v60 = vpack.c.bf16 %v454_v17, %v450_v52  ;;  %v4260_v36 = vsub.f32 %v264_v25, %v454_v17  ;;  %v4268_v39 = vpack.c.bf16 %v460_v32, %v456_v33  ;;  %v468_v25 = vand.u32 4294901760, %v273_v38  ;;  %v276_v3 = vld [vmem:[%s4037_s16 + $0x190] sm:$0xff] }
  0x35   : > { %6244 = vst [vmem:[#allocation73_spill] sm:$0xff] %v4246_v2  ;;  %6245 = vst [vmem:[#allocation74_spill] sm:$0xff] %v4248_v47  ;;  %v275_v47 = vld [vmem:[%s4037_s16 + $0x188] sm:$0xff]  ;;  %v4270_v52 = vsub.f32 %v269_v57, %v460_v32  ;;  %v466_v17 = vand.u32 4294901760, %v270_v37  ;;  %v4275_v11 = vpack.c.bf16 %v462_v46, %v458_v48  ;;  %v4277_v28 = vsub.f32 %v266_v55, %v458_v48 }
  0x36   : > { %6246 = vst [vmem:[#allocation75_spill] sm:$0xff] %v4250_v0  ;;  %6247 = vst [vmem:[#allocation76_spill] sm:$0xff] %v4256_v60  ;;  %v272_v0 = vld [vmem:[%s4037_s16 + $0x170] sm:$0xff]  ;;  %v4279_v21 = vsub.f32 %v268_v26, %v462_v46  ;;  %3187 = vmatpush1.bf16.msra.mxu1 %v4200_v1  ;;  %3507 = vmatpush1.bf16.msra.mxu0 %v4200_v1  ;;  %v4287_v57 = vpack.c.bf16 %v468_v25, %v464_v18  ;;  %v472_v26 = vand.u32 4294901760, %v275_v47  ;;  %v278_v1 = vld [vmem:[%s4037_s16 + $0x1a0] sm:$0xff] }
  0x37   : > { %6248 = vst [vmem:[#allocation77_spill] sm:$0xff] %v4258_v19  ;;  %6249 = vst [vmem:[#allocation78_spill] sm:$0xff] %v4260_v36  ;;  %v277_v36 = vld [vmem:[%s4037_s16 + $0x198] sm:$0xff]  ;;  %v274_v19 = vld [vmem:[%s4037_s16 + $0x180] sm:$0xff]  ;;  %v4289_v33 = vsub.f32 %v273_v38, %v468_v25  ;;  %v470_v32 = vand.u32 4294901760, %v272_v0  ;;  %v4291_v55 = vsub.f32 %v270_v37, %v466_v17  ;;  %3189 = vmatprep.subr.bf16.mxu1 %v4213_v40  ;;  %3509 = vmatprep.subr.bf16.mxu0 %v4213_v40 }
  0x38   : > { %6250 = vst [vmem:[#allocation79_spill] sm:$0xff] %v4264_v53  ;;  %6251 = vst [vmem:[#allocation80_spill] sm:$0xff] %v4268_v39  ;;  %v4281_v53 = vsub.f32 %v271_v22, %v464_v18  ;;  %v476_v22 = vand.u32 4294901760, %v277_v36  ;;  %v474_v48 = vand.u32 4294901760, %v274_v19  ;;  %v478_v46 = vand.u32 4294901760, %v276_v3  ;;  %v280_v37 = vld [vmem:[%s4037_s16 + $0x1b0] sm:$0xff] }
  0x39   : > { %6252 = vst [vmem:[#allocation81_spill] sm:$0xff] %v4270_v52  ;;  %6253 = vst [vmem:[#allocation82_spill] sm:$0xff] %v4275_v11  ;;  %v4296_v18 = vpack.c.bf16 %v470_v32, %v466_v17  ;;  %v480_v38 = vand.u32 4294901760, %v279_v24  ;;  %v484_v25 = vand.u32 4294901760, %v281_v54  ;;  %v4304_v40 = vsub.f32 %v275_v47, %v472_v26  ;;  %v285_v52 = vld [vmem:[%s4037_s16 + $0x1d8] sm:$0xff]  ;;  %v284_v17 = vld [vmem:[%s4037_s16 + $0x1d0] sm:$0xff] }
  0x3a   : > { %6254 = vst [vmem:[#allocation83_spill] sm:$0xff] %v4277_v28  ;;  %6255 = vst [vmem:[#allocation84_spill] sm:$0xff] %v4279_v21  ;;  %v4306_v21 = vsub.f32 %v277_v36, %v476_v22  ;;  %v4308_v28 = vpack.c.bf16 %v478_v46, %v474_v48  ;;  %3191 = vmatpush1.bf16.msra.mxu1 %v4217_v9  ;;  %3511 = vmatpush1.bf16.msra.mxu0 %v4217_v9  ;;  %v482_v47 = vand.u32 4294901760, %v278_v1  ;;  %v287_v36 = vld [vmem:[%s4037_s16 + $0x1e8] sm:$0xff] }
  0x3b   : > { %6256 = vst [vmem:[#allocation85_spill] sm:$0xff] %v4281_v53  ;;  %6257 = vst [vmem:[#allocation86_spill] sm:$0xff] %v4287_v57  ;;  %v4298_v53 = vsub.f32 %v272_v0, %v470_v32  ;;  %v4315_v0 = vsub.f32 %v274_v19, %v474_v48  ;;  %v4317_v32 = vsub.f32 %v276_v3, %v478_v46  ;;  %3193 = vmatprep.subr.bf16.mxu1 %v4227_v20  ;;  %v289_v19 = vld [vmem:[%s4037_s16 + $0x1f8] sm:$0xff] }
  0x3c   : > { %6258 = vst [vmem:[#allocation87_spill] sm:$0xff] %v4289_v33  ;;  %6259 = vst [vmem:[#allocation88_spill] sm:$0xff] %v4291_v55  ;;  %v283_v55 = vld [vmem:[%s4037_s16 + $0x1c8] sm:$0xff]  ;;  %v4302_v33 = vpack.c.bf16 %v476_v22, %v472_v26  ;;  %3513 = vmatprep.subr.bf16.mxu0 %v4227_v20  ;;  %v4324_v26 = vsub.f32 %v279_v24, %v480_v38  ;;  %v4326_v22 = vsub.f32 %v281_v54, %v484_v25  ;;  %v288_v54 = vld [vmem:[%s4037_s16 + $0x1f0] sm:$0xff] }
  0x3d   : > { %6260 = vst [vmem:[#allocation89_spill] sm:$0xff] %v4296_v18  ;;  %6261 = vst [vmem:[#allocation90_spill] sm:$0xff] %v4298_v53  ;;  %v4319_v53 = vpack.c.bf16 %v484_v25, %v480_v38  ;;  %v488_v9 = vand.u32 4294901760, %v283_v55  ;;  %v4329_v48 = vsub.f32 %v278_v1, %v482_v47  ;;  %v492_v3 = vand.u32 4294901760, %v285_v52 }
  0x3e   : > { %6262 = vst [vmem:[#allocation91_spill] sm:$0xff] %v4302_v33  ;;  %6263 = vst [vmem:[#allocation92_spill] sm:$0xff] %v4304_v40  ;;  %v490_v46 = vand.u32 4294901760, %v282_v23  ;;  %v496_v24 = vand.u32 4294901760, %v287_v36  ;;  %3195 = vmatpush1.bf16.msra.mxu1 %v4239_v62  ;;  %3515 = vmatpush1.bf16.msra.mxu0 %v4239_v62  ;;  %v500_v20 = vand.u32 4294901760, %v289_v19 }
  0x3f   : > { %6264 = vst [vmem:[#allocation93_spill] sm:$0xff] %v4306_v21  ;;  %6265 = vst [vmem:[#allocation94_spill] sm:$0xff] %v4308_v28  ;;  %v486_v21 = vand.u32 4294901760, %v280_v37  ;;  %v4336_v43 = vsub.f32 %v283_v55, %v488_v9  ;;  %v4341_v1 = vpack.c.bf16 %v492_v3, %v488_v9  ;;  %v4343_v38 = vsub.f32 %v285_v52, %v492_v3  ;;  %v293_v9 = vld [vmem:[%s4037_s16 + $0x218] sm:$0xff] }
  0x40   : > { %6266 = vst [vmem:[#allocation95_spill] sm:$0xff] %v4315_v0  ;;  %6267 = vst [vmem:[#allocation96_spill] sm:$0xff] %v4317_v32  ;;  %v494_v32 = vand.u32 4294901760, %v284_v17  ;;  %v286_v0 = vld [vmem:[%s4037_s16 + $0x1e0] sm:$0xff]  ;;  %3197 = vmatprep.subr.bf16.mxu1 %v4246_v2  ;;  %3517 = vmatprep.subr.bf16.mxu0 %v4246_v2  ;;  %v4357_v52 = vpack.c.bf16 %v500_v20, %v496_v24  ;;  %v4359_v3 = vsub.f32 %v289_v19, %v500_v20 }
  0x41   : > { %6268 = vst [vmem:[#allocation97_spill] sm:$0xff] %v4319_v53  ;;  %6269 = vst [vmem:[#allocation98_spill] sm:$0xff] %v4324_v26  ;;  %v4332_v40 = vpack.c.bf16 %v486_v21, %v482_v47  ;;  %v4334_v10 = vsub.f32 %v280_v37, %v486_v21  ;;  %v291_v47 = vld [vmem:[%s4037_s16 + $0x208] sm:$0xff]  ;;  %v4350_v21 = vsub.f32 %v282_v23, %v490_v46  ;;  %v498_v62 = vand.u32 4294901760, %v286_v0 }
  0x42   : > { %6270 = vst [vmem:[#allocation99_spill] sm:$0xff] %v4326_v22  ;;  %6273 = vst [vmem:[#allocation102_spill] sm:$0xff] %v4336_v43  ;;  %v4345_v25 = vpack.c.bf16 %v494_v32, %v490_v46  ;;  %v4352_v55 = vsub.f32 %v284_v17, %v494_v32  ;;  %v4354_v37 = vsub.f32 %v287_v36, %v496_v24  ;;  %v508_v43 = vand.u32 4294901760, %v4053_v30  ;;  %v290_v32 = vld [vmem:[%s4037_s16 + $0x200] sm:$0xff]  ;;  %v292_v30 = vld [vmem:[%s4037_s16 + $0x210] sm:$0xff] }
  0x43   : > { %6271 = vst [vmem:[#allocation100_spill] sm:$0xff] %v4332_v40  ;;  %6272 = vst [vmem:[#allocation101_spill] sm:$0xff] %v4334_v10  ;;  %v4362_v10 = vsub.f32 %v286_v0, %v498_v62  ;;  %v5844_v2 = vand.u32 4294901760, %v4082_v49  ;;  %v5845_v23 = vand.u32 4294901760, %v4084_v50  ;;  %v1846_v17 = vand.u32 4294901760, %v291_v47  ;;  %3199 = vmatpush1.bf16.msra.mxu1 %v4256_v60  ;;  %3519 = vmatpush1.bf16.msra.mxu0 %v4256_v60 }
  0x44   : > { %6274 = vst [vmem:[#allocation103_spill] sm:$0xff] %v4341_v1  ;;  %6275 = vst [vmem:[#allocation104_spill] sm:$0xff] %v4343_v38  ;;  %v502_v38 = vand.u32 4294901760, %v288_v54  ;;  %v1850_v20 = vand.u32 4294901760, %v293_v9  ;;  %3201 = vmatprep.subr.bf16.mxu1 %v4268_v39  ;;  %3521 = vmatprep.subr.bf16.mxu0 %v4268_v39  ;;  %v5854_v39 = vand.u32 4294901760, %v4093_v56  ;;  %v1848_v60 = vand.u32 4294901760, %v290_v32 }
  0x45   : > { %6276 = vst [vmem:[#allocation105_spill] sm:$0xff] %v4345_v25  ;;  %6277 = vst [vmem:[#allocation106_spill] sm:$0xff] %v4352_v55  ;;  %v572_v0 = vsub.f32 %v4082_v49, %v5844_v2  ;;  %v4383_v24 = vsub.f32 %v291_v47, %v1846_v17  ;;  %509 = vmatprep.mubr.f32.mxu1 %v508_v43  ;;  %v1852_v47 = vand.u32 4294901760, %v292_v30  ;;  %v304_v55 = vld [vmem:[%s4037_s16 + $0x270] sm:$0xff] }
  0x46   : > { %6278 = vst [vmem:[#allocation107_spill] sm:$0xff] %v4354_v37  ;;  %6279 = vst [vmem:[#allocation108_spill] sm:$0xff] %v4357_v52  ;;  %v4369_v36 = vpack.c.bf16 %v502_v38, %v498_v62  ;;  %v4371_v46 = vsub.f32 %v288_v54, %v502_v38  ;;  %v584_v62 = vsub.f32 %v4084_v50, %v5845_v23  ;;  %v5848_v54 = vand.u32 4294901760, %v4086_v51  ;;  %v295_v50 = vld [vmem:[%s4037_s16 + $0x228] sm:$0xff] }
  0x47   : > { %6280 = vst [vmem:[#allocation109_spill] sm:$0xff] %v4359_v3  ;;  %6281 = vst [vmem:[#allocation110_spill] sm:$0xff] %v4362_v10  ;;  %v4386_v38 = vpack.c.bf16 %v1850_v20, %v1846_v17  ;;  %v4388_v19 = vsub.f32 %v293_v9, %v1850_v20  ;;  %3203 = vmatpush1.bf16.msra.mxu1 %v4275_v11  ;;  %3523 = vmatpush1.bf16.msra.mxu0 %v4275_v11  ;;  %v5861_v17 = vand.u32 4294901760, %v4097_v58  ;;  %v296_v3 = vld [vmem:[%s4037_s16 + $0x230] sm:$0xff] }
  0x48   : > { %6282 = vst [vmem:[#allocation111_spill] sm:$0xff] %v4369_v36  ;;  %6283 = vst [vmem:[#allocation112_spill] sm:$0xff] %v4371_v46  ;;  %v573_v46 = vand.u32 4294901760, %v572_v0  ;;  %v585_v2 = vand.u32 4294901760, %v584_v62  ;;  %v578_v23 = vsub.f32 %v4086_v51, %v5848_v54  ;;  %v590_v43 = vsub.f32 %v4093_v56, %v5854_v39  ;;  %v297_v0 = vld [vmem:[%s4037_s16 + $0x238] sm:$0xff]  ;;  %v294_v62 = vld [vmem:[%s4037_s16 + $0x220] sm:$0xff]  ;;  %3205 = vmatprep.subr.bf16.mxu1 %v4287_v57 }
  0x49   : > { %6284 = vst [vmem:[#allocation113_spill] sm:$0xff] %v4386_v38  ;;  %v4400_v9 = vsub.f32 %v290_v32, %v1848_v60  ;;  %v5860_v20 = vand.u32 4294901760, %v4103_v61  ;;  %3525 = vmatprep.subr.bf16.mxu0 %v4287_v57  ;;  %v4410_v51 = vpack.c.bf16 %v1852_v47, %v1848_v60  ;;  %v4412_v49 = vsub.f32 %v292_v30, %v1852_v47 }
  0x4a   : > { %v4408_v54 = vpack.c.bf16 %v585_v2, %v573_v46  ;;  %v579_v11 = vand.u32 4294901760, %v578_v23  ;;  %v591_v39 = vand.u32 4294901760, %v590_v43  ;;  %v596_v32 = vsub.f32 %v4097_v58, %v5861_v17 }
  0x4b   : > { %6285 = vst [vmem:[#allocation114_spill] sm:$0xff] %v4400_v9  ;;  %6286 = vst [vmem:[#allocation115_spill] sm:$0xff] %v4410_v51  ;;  %v608_v56 = vsub.f32 %v4103_v61, %v5860_v20  ;;  %v1854_v10 = vand.u32 4294901760, %v295_v50  ;;  %v1858_v37 = vand.u32 4294901760, %v297_v0  ;;  %v5867_v2 = vand.u32 4294901760, %v4112_v12  ;;  %3207 = vmatpush1.bf16.msra.mxu1 %v4296_v18  ;;  %3527 = vmatpush1.bf16.msra.mxu0 %v4296_v18 }
  0x4c   : > { %v1856_v23 = vand.u32 4294901760, %v294_v62  ;;  %v4425_v46 = vpack.c.bf16 %v591_v39, %v579_v11  ;;  %v597_v30 = vand.u32 4294901760, %v596_v32  ;;  %3209 = vmatprep.subr.bf16.mxu1 %v4302_v33  ;;  %3529 = vmatprep.subr.bf16.mxu0 %v4302_v33  ;;  %v1860_v18 = vand.u32 4294901760, %v296_v3  ;;  %v299_v11 = vld [vmem:[%s4037_s16 + $0x248] sm:$0xff]  ;;  %v301_v39 = vld [vmem:[%s4037_s16 + $0x258] sm:$0xff]  ;;  %v298_v33 = vld [vmem:[%s4037_s16 + $0x240] sm:$0xff] }
  0x4d   : > { %v609_v47 = vand.u32 4294901760, %v608_v56  ;;  %v4427_v43 = vsub.f32 %v295_v50, %v1854_v10  ;;  %v4431_v20 = vpack.c.bf16 %v1858_v37, %v1854_v10  ;;  %v4433_v17 = vsub.f32 %v297_v0, %v1858_v37 }
  0x4e   : > { %v602_v60 = vsub.f32 %v4112_v12, %v5867_v2  ;;  %v6288_v50 = vand.u32 4294901760, %v4114_v13  ;;  %v4445_v32 = vsub.f32 %v294_v62, %v1856_v23  ;;  %v5869_v10 = vand.u32 4294901760, %v4121_v34  ;;  %v303_v12 = vld [vmem:[%s4037_s16 + $0x268] sm:$0xff] }
  0x4f   : > { %6287 = vst [vmem:[#allocation116_spill] sm:$0xff] %v4431_v20  ;;  %v4440_v57 = vpack.c.bf16 %v609_v47, %v597_v30  ;;  %v4449_v0 = vpack.c.bf16 %v1860_v18, %v1856_v23  ;;  %v4451_v61 = vsub.f32 %v296_v3, %v1860_v18  ;;  %v5879_v2 = vand.u32 4294901760, %v4123_v35  ;;  %3211 = vmatpush1.bf16.msra.mxu1 %v4308_v28  ;;  %v300_v23 = vld [vmem:[%s4037_s16 + $0x250] sm:$0xff] }
  0x50   : > { %v614_v56 = vsub.f32 %v4114_v13, %v6288_v50  ;;  %v603_v37 = vand.u32 4294901760, %v602_v60  ;;  %3531 = vmatpush1.bf16.msra.mxu0 %v4308_v28  ;;  %v620_v62 = vsub.f32 %v4121_v34, %v5869_v10  ;;  %v1862_v47 = vand.u32 4294901760, %v299_v11  ;;  %3213 = vmatprep.subr.bf16.mxu1 %v4319_v53 }
  0x51   : > { %6289 = vst [vmem:[#allocation117_spill] sm:$0xff] %v4449_v0  ;;  %v1866_v50 = vand.u32 4294901760, %v301_v39  ;;  %3533 = vmatprep.subr.bf16.mxu0 %v4319_v53  ;;  %v632_v18 = vsub.f32 %v4123_v35, %v5879_v2  ;;  %v5883_v3 = vand.u32 4294901760, %v4130_v41  ;;  %v5882_v60 = vand.u32 4294901760, %v4132_v42 }
  0x52   : > { %v615_v30 = vand.u32 4294901760, %v614_v56  ;;  %v1864_v56 = vand.u32 4294901760, %v298_v33  ;;  %v621_v10 = vand.u32 4294901760, %v620_v62  ;;  %v4471_v13 = vsub.f32 %v299_v11, %v1862_v47  ;;  %v305_v62 = vld [vmem:[%s4037_s16 + $0x278] sm:$0xff] }
  0x53   : > { %v4469_v34 = vpack.c.bf16 %v1866_v50, %v1862_v47  ;;  %v633_v53 = vand.u32 4294901760, %v632_v18  ;;  %v4474_v58 = vsub.f32 %v301_v39, %v1866_v50  ;;  %v626_v2 = vsub.f32 %v4130_v41, %v5883_v3  ;;  %3215 = vmatpush1.bf16.msra.mxu1 %v4332_v40  ;;  %v302_v3 = vld [vmem:[%s4037_s16 + $0x260] sm:$0xff] }
  0x54   : > { %v4467_v28 = vpack.c.bf16 %v615_v30, %v603_v37  ;;  %6291 = vst [vmem:[#allocation119_spill] sm:$0xff] %v4471_v13  ;;  %v638_v35 = vsub.f32 %v4132_v42, %v5882_v60  ;;  %3535 = vmatpush1.bf16.msra.mxu0 %v4332_v40  ;;  %v1868_v37 = vand.u32 4294901760, %v300_v23  ;;  %v4484_v11 = vsub.f32 %v298_v33, %v1864_v56 }
  0x55   : > { %6290 = vst [vmem:[#allocation118_spill] sm:$0xff] %v4469_v34  ;;  %6292 = vst [vmem:[#allocation120_spill] sm:$0xff] %v4474_v58  ;;  %v5892_v39 = vand.u32 4294901760, %v4136_v44  ;;  %v5891_v30 = vand.u32 4294901760, %v4140_v45  ;;  %3217 = vmatprep.subr.bf16.mxu1 %v4341_v1  ;;  %3537 = vmatprep.subr.bf16.mxu0 %v4341_v1  ;;  %v4491_v47 = vpack.c.bf16 %v633_v53, %v621_v10  ;;  %v627_v50 = vand.u32 4294901760, %v626_v2 }
  0x56   : > { %6293 = vst [vmem:[#allocation121_spill] sm:$0xff] %v4484_v11  ;;  %v639_v18 = vand.u32 4294901760, %v638_v35  ;;  %v1870_v60 = vand.u32 4294901760, %v303_v12  ;;  %v4494_v40 = vpack.c.bf16 %v1868_v37, %v1864_v56  ;;  %v4496_v42 = vsub.f32 %v300_v23, %v1868_v37 }
  0x57   : > { %v644_v33 = vsub.f32 %v4136_v44, %v5892_v39  ;;  %v656_v41 = vsub.f32 %v4140_v45, %v5891_v30  ;;  %v1874_v53 = vand.u32 4294901760, %v305_v62  ;;  %v5899_v2 = vand.u32 4294901760, %v4149_v6  ;;  %3219 = vmatpush1.bf16.msra.mxu1 %v4345_v25  ;;  %v307_v39 = vld [vmem:[%s4037_s16 + $0x288] sm:$0xff] }
  0x58   : > { %6294 = vst [vmem:[#allocation122_spill] sm:$0xff] %v4494_v40  ;;  %6295 = vst [vmem:[#allocation123_spill] sm:$0xff] %v4496_v42  ;;  %v4505_v1 = vpack.c.bf16 %v639_v18, %v627_v50  ;;  %v4507_v35 = vsub.f32 %v303_v12, %v1870_v60  ;;  %3539 = vmatpush1.bf16.msra.mxu0 %v4345_v25  ;;  %v5900_v56 = vand.u32 4294901760, %v4151_v7  ;;  %v1872_v37 = vand.u32 4294901760, %v302_v3 }
  0x59   : > { %v645_v10 = vand.u32 4294901760, %v644_v33  ;;  %v657_v23 = vand.u32 4294901760, %v656_v41  ;;  %3221 = vmatprep.subr.bf16.mxu1 %v4357_v52  ;;  %3541 = vmatprep.subr.bf16.mxu0 %v4357_v52  ;;  %v4515_v50 = vpack.c.bf16 %v1874_v53, %v1870_v60  ;;  %v4517_v12 = vsub.f32 %v305_v62, %v1874_v53  ;;  %v309_v33 = vld [vmem:[%s4037_s16 + $0x298] sm:$0xff]  ;;  %v306_v52 = vld [vmem:[%s4037_s16 + $0x280] sm:$0xff] }
  0x5a   : > { %v650_v18 = vsub.f32 %v4149_v6, %v5899_v2  ;;  %v1876_v30 = vand.u32 4294901760, %v304_v55  ;;  %v662_v41 = vsub.f32 %v4151_v7, %v5900_v56  ;;  %v4529_v45 = vsub.f32 %v302_v3, %v1872_v37 }
  0x5b   : > { %6296 = vst [vmem:[#allocation124_spill] sm:$0xff] %v4515_v50  ;;  %v4524_v25 = vpack.c.bf16 %v657_v23, %v645_v10  ;;  %v5904_v60 = vand.u32 4294901760, %v4153_v14  ;;  %v5909_v2 = vand.u32 4294901760, %v4160_v29  ;;  %3223 = vmatpush1.bf16.msra.mxu1 %v4369_v36  ;;  %v1878_v23 = vand.u32 4294901760, %v307_v39 }
  0x5c   : > { %v651_v62 = vand.u32 4294901760, %v650_v18  ;;  %v4533_v53 = vpack.c.bf16 %v1876_v30, %v1872_v37  ;;  %v4535_v44 = vsub.f32 %v304_v55, %v1876_v30  ;;  %3543 = vmatpush1.bf16.msra.mxu0 %v4369_v36  ;;  %v663_v10 = vand.u32 4294901760, %v662_v41  ;;  %3225 = vmatprep.subr.bf16.mxu1 %v4408_v54  ;;  %v308_v18 = vld [vmem:[%s4037_s16 + $0x290] sm:$0xff]  ;;  %v311_v54 = vld [vmem:[%s4037_s16 + $0x2a8] sm:$0xff] }
  0x5d   : > { %v668_v3 = vsub.f32 %v4153_v14, %v5904_v60  ;;  %v1882_v56 = vand.u32 4294901760, %v309_v33  ;;  %3545 = vmatprep.subr.bf16.mxu0 %v4386_v38  ;;  %v680_v55 = vsub.f32 %v4160_v29, %v5909_v2  ;;  %v1880_v41 = vand.u32 4294901760, %v306_v52  ;;  %v316_v29 = vld [vmem:[%s4037_s16 + $0x2d0] sm:$0xff] }
  0x5e   : > { %6297 = vst [vmem:[#allocation125_spill] sm:$0xff] %v4533_v53  ;;  %v4551_v36 = vpack.c.bf16 %v663_v10, %v651_v62  ;;  %v4555_v14 = vsub.f32 %v307_v39, %v1878_v23  ;;  %v6300_v38 = vand.u32 4294901760, %v4058_v31  ;;  %v6302_v37 = vand.u32 4294901760, %v4164_v15 }
  0x5f   : > { %v669_v7 = vand.u32 4294901760, %v668_v3  ;;  %v4553_v60 = vpack.c.bf16 %v1882_v56, %v1878_v23  ;;  %1816 = vmatmul.mubr.f32.vlgmr.msra.gmra.mrb[0].mxu0 %v3986_v4  ;;  %v681_v2 = vand.u32 4294901760, %v680_v55  ;;  %v4561_v30 = vsub.f32 %v309_v33, %v1882_v56  ;;  %v313_v33 = vld [vmem:[%s4037_s16 + $0x2b8] sm:$0xff] }
  0x60   : > { %6299 = vst [vmem:[#allocation127_spill] sm:$0xff] %v4555_v14  ;;  %515 = vmatmul.mubr.f32.vlgmr.msra.gmra.mrb[0].mxu1 %v6300_v38  ;;  %v674_v62 = vsub.f32 %v4164_v15, %v6302_v37  ;;  %v6303_v10 = vand.u32 4294901760, %v4169_v8  ;;  %3547 = vmatpush1.bf16.msra.mxu0 %v4410_v51  ;;  %v1884_v31 = vand.u32 4294901760, %v308_v18  ;;  %v4571_v38 = vsub.f32 %v306_v52, %v1880_v41  ;;  %v312_v15 = vld [vmem:[%s4037_s16 + $0x2b0] sm:$0xff] }
  0x61   : > { %6298 = vst [vmem:[#allocation126_spill] sm:$0xff] %v4553_v60  ;;  %6301 = vst [vmem:[#allocation128_spill] sm:$0xff] %v4561_v30  ;;  %3227 = vmatpush1.bf16.msra.mxu1 %v4425_v46  ;;  %v5917_v39 = vand.u32 4294901760, %v4171_v27  ;;  %v5916_v56 = vand.u32 4294901760, %v4178_v59  ;;  %3549 = vmatprep.subr.bf16.mxu0 %v4431_v20  ;;  %v4578_v23 = vpack.c.bf16 %v681_v2, %v669_v7  ;;  %v1886_v46 = vand.u32 4294901760, %v311_v54 }
  0x62   : > { %v686_v3 = vsub.f32 %v4169_v8, %v6303_v10  ;;  %3229 = vmatprep.subr.bf16.mxu1 %v4440_v57  ;;  %v675_v55 = vand.u32 4294901760, %v674_v62  ;;  %v310_v10 = vld [vmem:[%s4037_s16 + $0x2a0] sm:$0xff]  ;;  %v4581_v51 = vpack.c.bf16 %v1884_v31, %v1880_v41  ;;  %v4583_v8 = vsub.f32 %v308_v18, %v1884_v31  ;;  %1822 = vmatprep.mubr.f32.mxu0 %v3988_v5  ;;  %v6320_v5 = vld [vmem:[#allocation13_spill] sm:$0xff] }
  0x63   : > { %v692_v52 = vsub.f32 %v4171_v27, %v5917_v39  ;;  %v704_v57 = vsub.f32 %v4178_v59, %v5916_v56  ;;  %v1890_v2 = vand.u32 4294901760, %v313_v33  ;;  %v4595_v62 = vsub.f32 %v311_v54, %v1886_v46  ;;  %1824 = vmatmul.mubr.f32.gmra.mrb[2].mxu0 %v4024_v16  ;;  %v6306_v31 = vld [vmem:[#allocation54_spill] sm:$0xff] }
  0x64   : > { %v687_v37 = vand.u32 4294901760, %v686_v3  ;;  %6304 = vst [vmem:[#allocation129_spill] sm:$0xff] %v4581_v51  ;;  %v5928_v18 = vand.u32 4294901760, %v4180_v63  ;;  %3551 = vmatpush1.bf16.msra.mxu0 %v4449_v0  ;;  %v5931_v56 = vand.u32 4294901760, %v6306_v31  ;;  %v1892_v39 = vand.u32 4294901760, %v312_v15  ;;  %v315_v0 = vld [vmem:[%s4037_s16 + $0x2c8] sm:$0xff] }
  0x65   : > { %6305 = vst [vmem:[#allocation130_spill] sm:$0xff] %v4595_v62  ;;  %3231 = vmatpush1.bf16.msra.mxu1 %v4467_v28  ;;  %v693_v41 = vand.u32 4294901760, %v692_v52  ;;  %v705_v3 = vand.u32 4294901760, %v704_v57  ;;  %3553 = vmatprep.subr.bf16.mxu0 %v4469_v34  ;;  %v4604_v54 = vpack.c.bf16 %v1890_v2, %v1886_v46  ;;  %v317_v52 = vld [vmem:[%s4037_s16 + $0x2d8] sm:$0xff]  ;;  %v6310_v34 = vld [vmem:[#allocation56_spill] sm:$0xff]  ;;  %v314_v59 = vld [vmem:[%s4037_s16 + $0x2c0] sm:$0xff] }
  0x66   : > { %v4593_v7 = vpack.c.bf16 %v687_v37, %v675_v55  ;;  %v1888_v55 = vand.u32 4294901760, %v310_v10  ;;  %3233 = vmatprep.subr.bf16.mxu1 %v4491_v47  ;;  %v4606_v37 = vsub.f32 %v313_v33, %v1890_v2  ;;  %v698_v28 = vsub.f32 %v4180_v63, %v5928_v18  ;;  %v6311_v33 = vld [vmem:[#allocation11_spill] sm:$0xff]  ;;  %v6314_v63 = vld [vmem:[#allocation57_spill] sm:$0xff] }
  0x67   : > { %6307 = vst [vmem:[#allocation131_spill] sm:$0xff] %v4604_v54  ;;  %v4613_v20 = vpack.c.bf16 %v705_v3, %v693_v41  ;;  %v710_v57 = vsub.f32 %v6306_v31, %v5931_v56  ;;  %v5941_v46 = vand.u32 4294901760, %v6310_v34  ;;  %1830 = vmatprep.mubr.f32.mxu0 %v6311_v33  ;;  %v4625_v18 = vsub.f32 %v312_v15, %v1892_v39  ;;  %v6315_v3 = vld [vmem:[#allocation12_spill] sm:$0xff] }
  0x68   : > { %6308 = vst [vmem:[#allocation132_spill] sm:$0xff] %v4606_v37  ;;  %v4618_v47 = vsub.f32 %v310_v10, %v1888_v55  ;;  %v699_v2 = vand.u32 4294901760, %v698_v28  ;;  %v4623_v27 = vpack.c.bf16 %v1892_v39, %v1888_v55  ;;  %v5949_v41 = vand.u32 4294901760, %v6314_v63  ;;  %1832 = vmatmul.mubr.f32.gmra.mrb[4].mxu0 %v6315_v3  ;;  %v6316_v39 = vld [vmem:[#allocation59_spill] sm:$0xff]  ;;  %v6317_v55 = vld [vmem:[#allocation60_spill] sm:$0xff] }
  0x69   : > { %6313 = vst [vmem:[#allocation135_spill] sm:$0xff] %v4625_v18  ;;  %3235 = vmatpush1.bf16.msra.mxu1 %v4505_v1  ;;  %3555 = vmatpush1.bf16.msra.mxu0 %v4494_v40  ;;  %v711_v10 = vand.u32 4294901760, %v710_v57  ;;  %v716_v56 = vsub.f32 %v6310_v34, %v5941_v46  ;;  %v1894_v28 = vand.u32 4294901760, %v315_v0  ;;  %v1898_v31 = vand.u32 4294901760, %v317_v52 }
  0x6a   : > { %6309 = vst [vmem:[#allocation133_spill] sm:$0xff] %v4618_v47  ;;  %6312 = vst [vmem:[#allocation134_spill] sm:$0xff] %v4623_v27  ;;  %3237 = vmatprep.subr.bf16.mxu1 %v4524_v25  ;;  %3557 = vmatprep.subr.bf16.mxu0 %v4515_v50  ;;  %v728_v15 = vsub.f32 %v6314_v63, %v5949_v41  ;;  %v5950_v1 = vand.u32 4294901760, %v6316_v39  ;;  %v5951_v40 = vand.u32 4294901760, %v6317_v55  ;;  %v1896_v57 = vand.u32 4294901760, %v314_v59  ;;  %v319_v25 = vld [vmem:[%s4037_s16 + $0x2e8] sm:$0xff] }
  0x6b   : > { %v3246_v6 = vpack.c.bf16 %v711_v10, %v699_v2  ;;  %v717_v16 = vand.u32 4294901760, %v716_v56  ;;  %v4642_v46 = vpack.c.bf16 %v1898_v31, %v1894_v28  ;;  %v4644_v34 = vsub.f32 %v315_v0, %v1894_v28  ;;  %1838 = vmatprep.mubr.f32.mxu0 %v6320_v5  ;;  %v6322_v2 = vld [vmem:[#allocation14_spill] sm:$0xff]  ;;  %v6325_v28 = vld [vmem:[#allocation63_spill] sm:$0xff] }
  0x6c   : > { %v729_v50 = vand.u32 4294901760, %v728_v15  ;;  %v4648_v4 = vsub.f32 %v317_v52, %v1898_v31  ;;  %v722_v41 = vsub.f32 %v6316_v39, %v5950_v1  ;;  %v734_v56 = vsub.f32 %v6317_v55, %v5951_v40  ;;  %1840 = vmatmul.mubr.f32.gmra.mrb[6].mxu0 %v6322_v2  ;;  %v6324_v31 = vld [vmem:[#allocation61_spill] sm:$0xff] }
  0x6d   : > { %6318 = vst [vmem:[#allocation136_spill] sm:$0xff] %v4642_v46  ;;  %6319 = vst [vmem:[#allocation137_spill] sm:$0xff] %v4644_v34  ;;  %3239 = vmatpush1.bf16.msra.mxu1 %v4551_v36  ;;  %3559 = vmatpush1.bf16.msra.mxu0 %v4533_v53  ;;  %v1900_v0 = vand.u32 4294901760, %v316_v29  ;;  %v4659_v10 = vsub.f32 %v314_v59, %v1896_v57  ;;  %v5960_v52 = vand.u32 4294901760, %v6324_v31  ;;  %v5963_v15 = vand.u32 4294901760, %v6325_v28  ;;  %v321_v1 = vld [vmem:[%s4037_s16 + $0x2f8] sm:$0xff] }
  0x6e   : > { %6321 = vst [vmem:[#allocation138_spill] sm:$0xff] %v4648_v4  ;;  %3241 = vmatprep.subr.bf16.mxu1 %v4578_v23  ;;  %3561 = vmatprep.subr.bf16.mxu0 %v4553_v60  ;;  %v3248_v40 = vpack.c.bf16 %v729_v50, %v717_v16  ;;  %v723_v55 = vand.u32 4294901760, %v722_v41  ;;  %v735_v39 = vand.u32 4294901760, %v734_v56  ;;  %v1902_v63 = vand.u32 4294901760, %v319_v25  ;;  %v318_v36 = vld [vmem:[%s4037_s16 + $0x2e0] sm:$0xff]  ;;  %v320_v23 = vld [vmem:[%s4037_s16 + $0x2f0] sm:$0xff] }
  0x6f   : > { %6323 = vst [vmem:[#allocation139_spill] sm:$0xff] %v4659_v10  ;;  %v4667_v4 = vpack.c.bf16 %v1900_v0, %v1896_v57  ;;  %v4669_v53 = vsub.f32 %v316_v29, %v1900_v0  ;;  %v740_v59 = vsub.f32 %v6324_v31, %v5960_v52  ;;  %v752_v10 = vsub.f32 %v6325_v28, %v5963_v15  ;;  %v6328_v41 = vld [vmem:[#allocation65_spill] sm:$0xff]  ;;  %v6329_v0 = vld [vmem:[#allocation66_spill] sm:$0xff]  ;;  %v323_v15 = vld [vmem:[%s4037_s16 + $0x308] sm:$0xff] }
  0x70   : > { %v3250_v34 = vpack.c.bf16 %v735_v39, %v723_v55  ;;  %v1906_v16 = vand.u32 4294901760, %v321_v1  ;;  %v4678_v50 = vsub.f32 %v319_v25, %v1902_v63  ;;  %v5970_v57 = vand.u32 4294901760, %v6328_v41 }
  0x71   : > { %6326 = vst [vmem:[#allocation140_spill] sm:$0xff] %v4667_v4  ;;  %6327 = vst [vmem:[#allocation141_spill] sm:$0xff] %v4669_v53  ;;  %3243 = vmatpush1.bf16.msra.mxu1 %v4593_v7  ;;  %3563 = vmatpush1.bf16.msra.mxu0 %v4581_v51  ;;  %v741_v29 = vand.u32 4294901760, %v740_v59  ;;  %v753_v56 = vand.u32 4294901760, %v752_v10  ;;  %v5972_v52 = vand.u32 4294901760, %v6329_v0  ;;  %v1904_v60 = vand.u32 4294901760, %v318_v36 }
  0x72   : > { %3245 = vmatprep.subr.bf16.mxu1 %v4613_v20  ;;  %3565 = vmatprep.subr.bf16.mxu0 %v4604_v54  ;;  %v4686_v39 = vpack.c.bf16 %v1906_v16, %v1902_v63  ;;  %v4688_v55 = vsub.f32 %v321_v1, %v1906_v16  ;;  %v746_v7 = vsub.f32 %v6328_v41, %v5970_v57  ;;  %v1908_v25 = vand.u32 4294901760, %v320_v23  ;;  %v325_v59 = vld [vmem:[%s4037_s16 + $0x318] sm:$0xff]  ;;  %v6332_v20 = vld [vmem:[#allocation68_spill] sm:$0xff]  ;;  %v322_v63 = vld [vmem:[%s4037_s16 + $0x300] sm:$0xff] }
  0x73   : > { %v3252_v51 = vpack.c.bf16 %v753_v56, %v741_v29  ;;  %v758_v10 = vsub.f32 %v6329_v0, %v5972_v52  ;;  %v4698_v28 = vsub.f32 %v318_v36, %v1904_v60  ;;  %v5977_v54 = vand.u32 4294901760, %v6332_v20  ;;  %v6335_v57 = vld [vmem:[#allocation69_spill] sm:$0xff] }
  0x74   : > { %6330 = vst [vmem:[#allocation142_spill] sm:$0xff] %v4686_v39  ;;  %v747_v1 = vand.u32 4294901760, %v746_v7  ;;  %v4702_v16 = vpack.c.bf16 %v1908_v25, %v1904_v60  ;;  %v4704_v31 = vsub.f32 %v320_v23, %v1908_v25  ;;  %v5982_v41 = vand.u32 4294901760, %v6335_v57  ;;  %v6336_v23 = vld [vmem:[#allocation70_spill] sm:$0xff] }
  0x75   : > { %6331 = vst [vmem:[#allocation143_spill] sm:$0xff] %v4698_v28  ;;  %3247 = vmatpush1.bf16.msra.mxu1 %v3246_v6  ;;  %3567 = vmatpush1.bf16.msra.mxu0 %v4623_v27  ;;  %v759_v29 = vand.u32 4294901760, %v758_v10  ;;  %v764_v36 = vsub.f32 %v6332_v20, %v5977_v54  ;;  %v1910_v56 = vand.u32 4294901760, %v323_v15  ;;  %v1914_v52 = vand.u32 4294901760, %v325_v59  ;;  %v6337_v6 = vld [vmem:[#allocation72_spill] sm:$0xff] }
  0x76   : > { %6333 = vst [vmem:[#allocation144_spill] sm:$0xff] %v4702_v16  ;;  %6334 = vst [vmem:[#allocation145_spill] sm:$0xff] %v4704_v31  ;;  %3249 = vmatprep.subr.bf16.mxu1 %v3248_v40  ;;  %3569 = vmatprep.subr.bf16.mxu0 %v4642_v46  ;;  %v776_v60 = vsub.f32 %v6335_v57, %v5982_v41  ;;  %v5984_v7 = vand.u32 4294901760, %v6336_v23  ;;  %v5987_v25 = vand.u32 4294901760, %v6337_v6  ;;  %v324_v27 = vld [vmem:[%s4037_s16 + $0x310] sm:$0xff]  ;;  %v1912_v10 = vand.u32 4294901760, %v322_v63 }
  0x77   : > { %v3254_v0 = vpack.c.bf16 %v759_v29, %v747_v1  ;;  %v765_v31 = vand.u32 4294901760, %v764_v36  ;;  %v4718_v54 = vpack.c.bf16 %v1914_v52, %v1910_v56  ;;  %v4720_v20 = vsub.f32 %v323_v15, %v1910_v56  ;;  %v327_v40 = vld [vmem:[%s4037_s16 + $0x328] sm:$0xff]  ;;  %v6341_v29 = vld [vmem:[#allocation74_spill] sm:$0xff]  ;;  %v329_v56 = vld [vmem:[%s4037_s16 + $0x338] sm:$0xff] }
  0x78   : > { %v777_v46 = vand.u32 4294901760, %v776_v60  ;;  %v4723_v28 = vsub.f32 %v325_v59, %v1914_v52  ;;  %v770_v41 = vsub.f32 %v6336_v23, %v5984_v7  ;;  %v782_v57 = vsub.f32 %v6337_v6, %v5987_v25  ;;  %v6342_v52 = vld [vmem:[#allocation75_spill] sm:$0xff]  ;;  %v326_v25 = vld [vmem:[%s4037_s16 + $0x320] sm:$0xff] }
  0x79   : > { %6338 = vst [vmem:[#allocation146_spill] sm:$0xff] %v4718_v54  ;;  %3251 = vmatpush1.bf16.msra.mxu1 %v3250_v34  ;;  %3571 = vmatpush1.bf16.msra.mxu0 %v4667_v4  ;;  %v1916_v1 = vand.u32 4294901760, %v324_v27  ;;  %v4732_v15 = vsub.f32 %v322_v63, %v1912_v10  ;;  %v5992_v36 = vand.u32 4294901760, %v6341_v29  ;;  %v5995_v59 = vand.u32 4294901760, %v6342_v52 }
  0x7a   : > { %6339 = vst [vmem:[#allocation147_spill] sm:$0xff] %v4723_v28  ;;  %3253 = vmatprep.subr.bf16.mxu1 %v3252_v51  ;;  %3573 = vmatprep.subr.bf16.mxu0 %v4686_v39  ;;  %v3256_v60 = vpack.c.bf16 %v777_v46, %v765_v31  ;;  %v771_v7 = vand.u32 4294901760, %v770_v41  ;;  %v783_v23 = vand.u32 4294901760, %v782_v57  ;;  %v1918_v28 = vand.u32 4294901760, %v327_v40  ;;  %v328_v51 = vld [vmem:[%s4037_s16 + $0x330] sm:$0xff]  ;;  %v6345_v41 = vld [vmem:[#allocation77_spill] sm:$0xff] }
  0x7b   : > { %6340 = vst [vmem:[#allocation148_spill] sm:$0xff] %v4732_v15  ;;  %v4739_v34 = vpack.c.bf16 %v1916_v1, %v1912_v10  ;;  %v4741_v4 = vsub.f32 %v324_v27, %v1916_v1  ;;  %v788_v63 = vsub.f32 %v6341_v29, %v5992_v36  ;;  %v800_v6 = vsub.f32 %v6342_v52, %v5995_v59  ;;  %v6346_v1 = vld [vmem:[#allocation78_spill] sm:$0xff] }
  0x7c   : > { %v3258_v15 = vpack.c.bf16 %v783_v23, %v771_v7  ;;  %v1922_v46 = vand.u32 4294901760, %v329_v56  ;;  %v4750_v31 = vsub.f32 %v327_v40, %v1918_v28  ;;  %v6004_v57 = vand.u32 4294901760, %v6345_v41  ;;  %v331_v40 = vld [vmem:[%s4037_s16 + $0x348] sm:$0xf] }
  0x7d   : > { %6343 = vst [vmem:[#allocation149_spill] sm:$0xff] %v4739_v34  ;;  %6344 = vst [vmem:[#allocation150_spill] sm:$0xff] %v4741_v4  ;;  %3255 = vmatpush1.bf16.msra.mxu1 %v3254_v0  ;;  %3575 = vmatpush1.bf16.msra.mxu0 %v4702_v16  ;;  %v789_v27 = vand.u32 4294901760, %v788_v63  ;;  %v801_v10 = vand.u32 4294901760, %v800_v6  ;;  %v6003_v36 = vand.u32 4294901760, %v6346_v1  ;;  %v1920_v39 = vand.u32 4294901760, %v326_v25 }
  0x7e   : > { %3257 = vmatprep.subr.bf16.mxu1 %v3256_v60  ;;  %3577 = vmatprep.subr.bf16.mxu0 %v4718_v54  ;;  %v4756_v59 = vpack.c.bf16 %v1922_v46, %v1918_v28  ;;  %v4758_v23 = vsub.f32 %v329_v56, %v1922_v46  ;;  %v794_v7 = vsub.f32 %v6345_v41, %v6004_v57  ;;  %v1924_v0 = vand.u32 4294901760, %v328_v51  ;;  %v6349_v60 = vld [vmem:[#allocation79_spill] sm:$0xff]  ;;  %v330_v54 = vld [vmem:[%s4037_s16 + $0x340] sm:$0xf]  ;;  %v6351_v46 = vld [vmem:[#allocation81_spill] sm:$0xff] }
  0x7f   : > { %v3260_v16 = vpack.c.bf16 %v801_v10, %v789_v27  ;;  %v806_v6 = vsub.f32 %v6346_v1, %v6003_v36  ;;  %v4767_v63 = vsub.f32 %v326_v25, %v1920_v39  ;;  %v6005_v52 = vand.u32 4294901760, %v6349_v60  ;;  %v6352_v36 = vld [vmem:[#allocation83_spill] sm:$0xff] }
  0x80   : > { %6347 = vst [vmem:[#allocation151_spill] sm:$0xff] %v4756_v59  ;;  %6348 = vst [vmem:[#allocation152_spill] sm:$0xff] %v4758_v23  ;;  %v795_v28 = vand.u32 4294901760, %v794_v7  ;;  %v4771_v29 = vpack.c.bf16 %v1924_v0, %v1920_v39  ;;  %v4773_v56 = vsub.f32 %v328_v51, %v1924_v0  ;;  %v6008_v23 = vand.u32 4294901760, %v6351_v46  ;;  %v6354_v51 = vld [vmem:[#allocation84_spill] sm:$0xff] }
  0x81   : > { %3259 = vmatpush1.bf16.msra.mxu1 %v3258_v15  ;;  %3579 = vmatpush1.bf16.msra.mxu0 %v4739_v34  ;;  %v807_v27 = vand.u32 4294901760, %v806_v6  ;;  %v812_v10 = vsub.f32 %v6349_v60, %v6005_v52  ;;  %v4781_v25 = vsel %vm369_vm1, %v331_v40, 0  ;;  %v6013_v57 = vand.u32 4294901760, %v6352_v36  ;;  %v6356_v34 = vld [vmem:[#allocation17_spill] sm:$0xff] }
  0x82   : > { %6350 = vst [vmem:[#allocation153_spill] sm:$0xff] %v4771_v29  ;;  %3261 = vmatprep.subr.bf16.mxu1 %v3260_v16  ;;  %3581 = vmatprep.subr.bf16.mxu0 %v4756_v59  ;;  %v824_v39 = vsub.f32 %v6351_v46, %v6008_v23  ;;  %v4789_v15 = vand.u32 4294901760, %v4781_v25  ;;  %v6015_v7 = vand.u32 4294901760, %v6354_v51  ;;  %v371_v0 = vsel %vm369_vm1, %v330_v54, 0 }
  0x83   : > { %v3262_v6 = vpack.c.bf16 %v807_v27, %v795_v28  ;;  %v813_v52 = vand.u32 4294901760, %v812_v10  ;;  %v818_v40 = vsub.f32 %v6352_v36, %v6013_v57  ;;  %v4796_v16 = vand.u32 4294901760, %v371_v0  ;;  %v6357_v10 = vld [vmem:[#allocation15_spill] sm:$0xff] }
  0x84   : > { %6353 = vst [vmem:[#allocation154_spill] sm:$0xff] %v4789_v15  ;;  %v825_v59 = vand.u32 4294901760, %v824_v39  ;;  %v830_v23 = vsub.f32 %v6354_v51, %v6015_v7  ;;  %v6018_v46 = vand.u32 4294901760, %v6356_v34  ;;  %v6021_v60 = vand.u32 4294901760, %v4383_v24 }
  0x85   : > { %6355 = vst [vmem:[#allocation155_spill] sm:$0xff] %v4796_v16  ;;  %3263 = vmatpush1.bf16.msra.mxu1 %v3262_v6  ;;  %3583 = vmatpush1.bf16.msra.mxu0 %v4771_v29  ;;  %v819_v54 = vand.u32 4294901760, %v818_v40  ;;  %v4805_v28 = vsub.f32 %v371_v0, %v4796_v16  ;;  %v6023_v27 = vand.u32 4294901760, %v4388_v19  ;;  %v6024_v57 = vand.u32 4294901760, %v6357_v10 }
  0x86   : > { %v3264_v39 = vpack.c.bf16 %v825_v59, %v813_v52  ;;  %1927 = vmatprep.subr.mxu0 %v4789_v15  ;;  %v831_v36 = vand.u32 4294901760, %v830_v23  ;;  %v1955_v7 = vsub.f32 %v6356_v34, %v6018_v46  ;;  %v2020_v6 = vsub.f32 %v4383_v24, %v6021_v60  ;;  %v6358_v34 = vld [vmem:[#allocation85_spill] sm:$0xff] }
  0x87   : > { %v2032_v0 = vsub.f32 %v4388_v19, %v6023_v27  ;;  %v1961_v40 = vsub.f32 %v6357_v10, %v6024_v57  ;;  %v6028_v52 = vand.u32 4294901760, %v4400_v9  ;;  %v6034_v59 = vand.u32 4294901760, %v4412_v49 }
  0x88   : > { %3265 = vmatprep.subr.bf16.mxu1 %v3264_v39  ;;  %v3266_v23 = vpack.c.bf16 %v831_v36, %v819_v54  ;;  %v1956_v29 = vand.u32 4294901760, %v1955_v7  ;;  %v2021_v46 = vand.u32 4294901760, %v2020_v6  ;;  %v6032_v51 = vand.u32 4294901760, %v6358_v34  ;;  %v6359_v7 = vld [vmem:[#allocation87_spill] sm:$0xff]  ;;  %v6360_v39 = vld [vmem:[#allocation88_spill] sm:$0xff] }
  0x89   : > { %1929 = vmatpush1.msra.mxu0 %v4796_v16  ;;  %v2033_v60 = vand.u32 4294901760, %v2032_v0  ;;  %v1962_v1 = vand.u32 4294901760, %v1961_v40  ;;  %v2026_v27 = vsub.f32 %v4400_v9, %v6028_v52  ;;  %v2038_v57 = vsub.f32 %v4412_v49, %v6034_v59  ;;  %v6361_v0 = vld [vmem:[#allocation90_spill] sm:$0xff] }
  0x8a   : > { %3267 = vmatpush1.bf16.msra.mxu1 %v3266_v23  ;;  %1957 = vmatprep.mubr.f32.mxu0 %v1956_v29  ;;  %v836_v36 = vsub.f32 %v6358_v34, %v6032_v51  ;;  %v6033_v54 = vand.u32 4294901760, %v6359_v7  ;;  %v6035_v6 = vand.u32 4294901760, %v6360_v39  ;;  %v6036_v40 = vand.u32 4294901760, %v6361_v0 }
  0x8b   : > { %v3584_v16 = vpack.c.bf16 %v2033_v60, %v2021_v46  ;;  %1963 = vmatmul.mubr.f32.vlgmr.msra.gmra.mrb[0].mxu0 %v1962_v1  ;;  %v2027_v10 = vand.u32 4294901760, %v2026_v27  ;;  %v2039_v52 = vand.u32 4294901760, %v2038_v57  ;;  %v6037_v41 = vand.u32 4294901760, %v4427_v43 }
  0x8c   : > { %v837_v9 = vand.u32 4294901760, %v836_v36  ;;  %v848_v29 = vsub.f32 %v6359_v7, %v6033_v54  ;;  %v842_v23 = vsub.f32 %v6360_v39, %v6035_v6  ;;  %v854_v51 = vsub.f32 %v6361_v0, %v6036_v40  ;;  %v6364_v39 = vld [vmem:[#allocation95_spill] sm:$0xff] }
  0x8d   : > { %3585 = vmatprep.subr.bf16.mxu0 %v3584_v16  ;;  %v3586_v60 = vpack.c.bf16 %v2039_v52, %v2027_v10  ;;  %v2044_v57 = vsub.f32 %v4427_v43, %v6037_v41  ;;  %v6039_v1 = vand.u32 4294901760, %v4433_v17  ;;  %v6042_v46 = vand.u32 4294901760, %v4445_v32  ;;  %v6362_v52 = vld [vmem:[#allocation92_spill] sm:$0xff] }
  0x8e   : > { %v849_v27 = vand.u32 4294901760, %v848_v29  ;;  %v843_v36 = vand.u32 4294901760, %v842_v23  ;;  %v855_v54 = vand.u32 4294901760, %v854_v51  ;;  %v6043_v59 = vand.u32 4294901760, %v4451_v61  ;;  %v6363_v29 = vld [vmem:[#allocation93_spill] sm:$0xff] }
  0x8f   : > { %3587 = vmatpush1.bf16.msra.mxu0 %v3586_v60  ;;  %v2045_v6 = vand.u32 4294901760, %v2044_v57  ;;  %v2056_v16 = vsub.f32 %v4433_v17, %v6039_v1  ;;  %v2050_v10 = vsub.f32 %v4445_v32, %v6042_v46  ;;  %v6044_v40 = vand.u32 4294901760, %v6362_v52 }
  0x90   : > { %v3268_v41 = vpack.c.bf16 %v849_v27, %v837_v9  ;;  %v3270_v0 = vpack.c.bf16 %v855_v54, %v843_v36  ;;  %v2062_v51 = vsub.f32 %v4451_v61, %v6043_v59  ;;  %v6046_v23 = vand.u32 4294901760, %v6363_v29  ;;  %v6365_v54 = vld [vmem:[#allocation96_spill] sm:$0xff] }
  0x91   : > { %v2057_v60 = vand.u32 4294901760, %v2056_v16  ;;  %v2051_v57 = vand.u32 4294901760, %v2050_v10  ;;  %v860_v1 = vsub.f32 %v6362_v52, %v6044_v40  ;;  %v6047_v7 = vand.u32 4294901760, %v6364_v39 }
  0x92   : > { %3269 = vmatprep.subr.bf16.mxu1 %v3268_v41  ;;  %v2063_v46 = vand.u32 4294901760, %v2062_v51  ;;  %v872_v9 = vsub.f32 %v6363_v29, %v6046_v23  ;;  %v6048_v27 = vand.u32 4294901760, %v6365_v54  ;;  %v6051_v36 = vand.u32 4294901760, %v4471_v13 }
  0x93   : > { %3271 = vmatpush1.bf16.msra.mxu1 %v3270_v0  ;;  %v3588_v59 = vpack.c.bf16 %v2057_v60, %v2045_v6  ;;  %v861_v16 = vand.u32 4294901760, %v860_v1  ;;  %v866_v10 = vsub.f32 %v6364_v39, %v6047_v7  ;;  %v6050_v40 = vand.u32 4294901760, %v4474_v58  ;;  %v6366_v7 = vld [vmem:[#allocation18_spill] sm:$0xff] }
  0x94   : > { %v3590_v52 = vpack.c.bf16 %v2063_v46, %v2051_v57  ;;  %v873_v41 = vand.u32 4294901760, %v872_v9  ;;  %v878_v51 = vsub.f32 %v6365_v54, %v6048_v27  ;;  %v2068_v23 = vsub.f32 %v4471_v13, %v6051_v36 }
  0x95   : > { %3589 = vmatprep.subr.bf16.mxu0 %v3588_v59  ;;  %v867_v0 = vand.u32 4294901760, %v866_v10  ;;  %v2080_v6 = vsub.f32 %v4474_v58, %v6050_v40  ;;  %v6052_v1 = vand.u32 4294901760, %v4484_v11  ;;  %v6054_v60 = vand.u32 4294901760, %v4496_v42 }
  0x96   : > { %3591 = vmatpush1.bf16.msra.mxu0 %v3590_v52  ;;  %v3272_v46 = vpack.c.bf16 %v873_v41, %v861_v16  ;;  %v879_v57 = vand.u32 4294901760, %v878_v51  ;;  %v2069_v9 = vand.u32 4294901760, %v2068_v23  ;;  %v524_v27 = vand.u32 4294901760, %v6366_v7  ;;  %v6367_v16 = vld [vmem:[#allocation16_spill] sm:$0xff] }
  0x97   : > { %v2081_v54 = vand.u32 4294901760, %v2080_v6  ;;  %v2074_v59 = vsub.f32 %v4484_v11, %v6052_v1  ;;  %v2086_v10 = vsub.f32 %v4496_v42, %v6054_v60  ;;  %v6053_v40 = vand.u32 4294901760, %v4324_v26 }
  0x98   : > { %3273 = vmatprep.subr.bf16.mxu1 %v3272_v46  ;;  %v3274_v36 = vpack.c.bf16 %v879_v57, %v867_v0  ;;  %525 = vmatprep.mubr.f32.mxu1 %v524_v27  ;;  %v6055_v52 = vand.u32 4294901760, %v4326_v22  ;;  %v6056_v23 = vand.u32 4294901760, %v6367_v16  ;;  %v6057_v7 = vand.u32 4294901760, %v4329_v48 }
  0x99   : > { %v3592_v41 = vpack.c.bf16 %v2081_v54, %v2069_v9  ;;  %v2075_v51 = vand.u32 4294901760, %v2074_v59  ;;  %v2087_v6 = vand.u32 4294901760, %v2086_v10  ;;  %v884_v1 = vsub.f32 %v4324_v26, %v6053_v40  ;;  %v6368_v54 = vld [vmem:[#allocation101_spill] sm:$0xff] }
  0x9a   : > { %3275 = vmatpush1.bf16.msra.mxu1 %v3274_v36  ;;  %v896_v46 = vsub.f32 %v4326_v22, %v6055_v52  ;;  %v529_v27 = vsub.f32 %v6367_v16, %v6056_v23  ;;  %v890_v0 = vsub.f32 %v4329_v48, %v6057_v7  ;;  %v6058_v57 = vand.u32 4294901760, %v6368_v54 }
  0x9b   : > { %3593 = vmatprep.subr.bf16.mxu0 %v3592_v41  ;;  %v3594_v9 = vpack.c.bf16 %v2087_v6, %v2075_v51  ;;  %v885_v59 = vand.u32 4294901760, %v884_v1  ;;  %v6059_v10 = vand.u32 4294901760, %v4507_v35  ;;  %v6061_v36 = vand.u32 4294901760, %v4517_v12 }
  0x9c   : > { %v897_v40 = vand.u32 4294901760, %v896_v46  ;;  %v530_v60 = vand.u32 4294901760, %v529_v27  ;;  %v891_v52 = vand.u32 4294901760, %v890_v0  ;;  %v902_v23 = vsub.f32 %v6368_v54, %v6058_v57  ;;  %v3908_v27 = vld [vmem:[%s5764_s0 + $0x48] sm:$0xff] }
  0x9d   : > { %3595 = vmatpush1.bf16.msra.mxu0 %v3594_v9  ;;  %v2092_v7 = vsub.f32 %v4507_v35, %v6059_v10  ;;  %v2104_v1 = vsub.f32 %v4517_v12, %v6061_v36  ;;  %v6064_v41 = vand.u32 4294901760, %v4529_v45  ;;  %v6067_v51 = vand.u32 4294901760, %v4535_v44  ;;  %v6370_v9 = vld [vmem:[#allocation102_spill] sm:$0xff] }
  0x9e   : > { %v3276_v6 = vpack.c.bf16 %v897_v40, %v885_v59  ;;  %531 = vmatmul.mubr.f32.gmra.mrb[2].mxu1 %v530_v60  ;;  %v903_v46 = vand.u32 4294901760, %v902_v23  ;;  %v4930_v0 = vsub.f32 %v3908_v27, %v6311_v33  ;;  %v6066_v57 = vand.u32 4294901760, %v6370_v9  ;;  %v6371_v27 = vld [vmem:[#allocation104_spill] sm:$0xff] }
  0x9f   : > { %v2093_v10 = vand.u32 4294901760, %v2092_v7  ;;  %v2105_v16 = vand.u32 4294901760, %v2104_v1  ;;  %v2098_v36 = vsub.f32 %v4529_v45, %v6064_v41  ;;  %v2110_v40 = vsub.f32 %v4535_v44, %v6067_v51  ;;  %v3909_v41 = vld [vmem:[%s5764_s0 + $0x40] sm:$0xff] }
  0xa0   : > { %6369 = vst [vmem:[#allocation18_spill] sm:$0xff] %v4930_v0  ;;  %3277 = vmatprep.subr.bf16.mxu1 %v3276_v6  ;;  %v3278_v60 = vpack.c.bf16 %v903_v46, %v891_v52  ;;  %v6068_v23 = vand.u32 4294901760, %v4930_v0  ;;  %v908_v59 = vsub.f32 %v6370_v9, %v6066_v57  ;;  %v6070_v39 = vand.u32 4294901760, %v6371_v27 }
  0xa1   : > { %v3596_v7 = vpack.c.bf16 %v2105_v16, %v2093_v10  ;;  %v2099_v1 = vand.u32 4294901760, %v2098_v36  ;;  %v2111_v29 = vand.u32 4294901760, %v2110_v40  ;;  %v4948_v34 = vsub.f32 %v3909_v41, %v6315_v3  ;;  %v6373_v40 = vld [vmem:[#allocation106_spill] sm:$0xff] }
  0xa2   : > { %3279 = vmatpush1.bf16.msra.mxu1 %v3278_v60  ;;  %v539_v52 = vsub.f32 %v4930_v0, %v6068_v23  ;;  %v909_v6 = vand.u32 4294901760, %v908_v59  ;;  %v920_v46 = vsub.f32 %v6371_v27, %v6070_v39  ;;  %v6069_v16 = vand.u32 4294901760, %v4350_v21 }
  0xa3   : > { %6372 = vst [vmem:[#allocation101_spill] sm:$0xff] %v4948_v34  ;;  %3597 = vmatprep.subr.bf16.mxu0 %v3596_v7  ;;  %v3598_v10 = vpack.c.bf16 %v2111_v29, %v2099_v1  ;;  %v6071_v36 = vand.u32 4294901760, %v4948_v34  ;;  %v6076_v57 = vand.u32 4294901760, %v6373_v40  ;;  %v6077_v41 = vand.u32 4294901760, %v4555_v14 }
  0xa4   : > { %v540_v60 = vand.u32 4294901760, %v539_v52  ;;  %v921_v51 = vand.u32 4294901760, %v920_v46  ;;  %v914_v59 = vsub.f32 %v4350_v21, %v6069_v16  ;;  %v6078_v23 = vand.u32 4294901760, %v4561_v30 }
  0xa5   : > { %3599 = vmatpush1.bf16.msra.mxu0 %v3598_v10  ;;  %v545_v7 = vsub.f32 %v4948_v34, %v6071_v36  ;;  %v926_v29 = vsub.f32 %v6373_v40, %v6076_v57  ;;  %v2116_v1 = vsub.f32 %v4555_v14, %v6077_v41  ;;  %v6079_v52 = vand.u32 4294901760, %v4571_v38  ;;  %v6379_v40 = vld [vmem:[#allocation112_spill] sm:$0xff] }
  0xa6   : > { %541 = vmatprep.mubr.f32.mxu1 %v540_v60  ;;  %v3280_v46 = vpack.c.bf16 %v921_v51, %v909_v6  ;;  %v915_v16 = vand.u32 4294901760, %v914_v59  ;;  %v2128_v10 = vsub.f32 %v4561_v30, %v6078_v23  ;;  %v6080_v39 = vand.u32 4294901760, %v4583_v8  ;;  %v3910_v6 = vld [vmem:[%s5764_s0 + $0x68] sm:$0xf]  ;;  %v6376_v23 = vld [vmem:[#allocation109_spill] sm:$0xff] }
  0xa7   : > { %v546_v36 = vand.u32 4294901760, %v545_v7  ;;  %v927_v34 = vand.u32 4294901760, %v926_v29  ;;  %v2117_v0 = vand.u32 4294901760, %v2116_v1  ;;  %v2122_v57 = vsub.f32 %v4571_v38, %v6079_v52  ;;  %v6375_v59 = vld [vmem:[#allocation107_spill] sm:$0xff] }
  0xa8   : > { %3281 = vmatprep.subr.bf16.mxu1 %v3280_v46  ;;  %v2129_v41 = vand.u32 4294901760, %v2128_v10  ;;  %v2134_v51 = vsub.f32 %v4583_v8, %v6080_v39  ;;  %v4988_v60 = vsub.f32 %v3910_v6, %v6320_v5  ;;  %v6086_v7 = vand.u32 4294901760, %v6375_v59  ;;  %v3911_v46 = vld [vmem:[%s5764_s0 + $0x60] sm:$0xf] }
  0xa9   : > { %547 = vmatmul.mubr.f32.gmra.mrb[4].mxu1 %v546_v36  ;;  %v3282_v29 = vpack.c.bf16 %v927_v34, %v915_v16  ;;  %v2123_v1 = vand.u32 4294901760, %v2122_v57  ;;  %v6087_v52 = vand.u32 4294901760, %v6376_v23  ;;  %v4996_v10 = vsub.f32 %v3911_v46, %v6322_v2  ;;  %v6378_v16 = vld [vmem:[#allocation110_spill] sm:$0xff] }
  0xaa   : > { %6374 = vst [vmem:[#allocation156_spill] sm:$0xff] %v4988_v60  ;;  %v3600_v39 = vpack.c.bf16 %v2129_v41, %v2117_v0  ;;  %v2135_v30 = vand.u32 4294901760, %v2134_v51  ;;  %v6089_v14 = vand.u32 4294901760, %v4988_v60  ;;  %v932_v6 = vsub.f32 %v6375_v59, %v6086_v7 }
  0xab   : > { %6377 = vst [vmem:[#allocation157_spill] sm:$0xff] %v4996_v10  ;;  %3283 = vmatpush1.bf16.msra.mxu1 %v3282_v29  ;;  %v944_v34 = vsub.f32 %v6376_v23, %v6087_v52  ;;  %v6090_v57 = vand.u32 4294901760, %v4996_v10  ;;  %v6095_v36 = vand.u32 4294901760, %v6378_v16  ;;  %v6096_v46 = vand.u32 4294901760, %v6379_v40 }
  0xac   : > { %3601 = vmatprep.subr.bf16.mxu0 %v3600_v39  ;;  %v3602_v0 = vpack.c.bf16 %v2135_v30, %v2123_v1  ;;  %v555_v41 = vsub.f32 %v4988_v60, %v6089_v14  ;;  %v933_v51 = vand.u32 4294901760, %v932_v6  ;;  %v6097_v7 = vand.u32 4294901760, %v4595_v62 }
  0xad   : > { %v945_v29 = vand.u32 4294901760, %v944_v34  ;;  %v561_v52 = vsub.f32 %v4996_v10, %v6090_v57  ;;  %v938_v23 = vsub.f32 %v6378_v16, %v6095_v36  ;;  %v950_v30 = vsub.f32 %v6379_v40, %v6096_v46 }
  0xae   : > { %3603 = vmatpush1.bf16.msra.mxu0 %v3602_v0  ;;  %v556_v39 = vand.u32 4294901760, %v555_v41  ;;  %v2140_v1 = vsub.f32 %v4595_v62, %v6097_v7  ;;  %v6102_v6 = vand.u32 4294901760, %v4606_v37  ;;  %v6103_v34 = vand.u32 4294901760, %v4618_v47  ;;  %v6380_v62 = vld [vmem:[#allocation20_spill] sm:$0xff] }
  0xaf   : > { %v3284_v14 = vpack.c.bf16 %v945_v29, %v933_v51  ;;  %v562_v57 = vand.u32 4294901760, %v561_v52  ;;  %v939_v10 = vand.u32 4294901760, %v938_v23  ;;  %v951_v60 = vand.u32 4294901760, %v950_v30  ;;  %v6381_v51 = vld [vmem:[#allocation21_spill] sm:$0xff]  ;;  %v6382_v23 = vld [vmem:[#allocation22_spill] sm:$0xff]  ;;  %v6383_v29 = vld [vmem:[#allocation24_spill] sm:$0xff] }
  0xb0   : > { %557 = vmatprep.mubr.f32.mxu1 %v556_v39  ;;  %v2141_v36 = vand.u32 4294901760, %v2140_v1  ;;  %v2152_v46 = vsub.f32 %v4606_v37, %v6102_v6  ;;  %v2146_v0 = vsub.f32 %v4618_v47, %v6103_v34  ;;  %v6106_v41 = vand.u32 4294901760, %v4625_v18  ;;  %v6384_v39 = vld [vmem:[#allocation137_spill] sm:$0xff]  ;;  %v6385_v34 = vld [vmem:[#allocation2_spill] sm:$0xff] }
  0xb1   : > { %3285 = vmatprep.subr.bf16.mxu1 %v3284_v14  ;;  %563 = vmatmul.mubr.f32.gmra.mrb[6].mxu1 %v562_v57  ;;  %v3286_v7 = vpack.c.bf16 %v951_v60, %v939_v10  ;;  %v3288_v52 = vpack.c.bf16 %v6381_v51, %v6380_v62  ;;  %v3290_v30 = vpack.c.bf16 %v6383_v29, %v6382_v23  ;;  %v6111_v1 = vand.u32 4294901760, %v6384_v39  ;;  %v6386_v47 = vld [vmem:[#allocation138_spill] sm:$0xff]  ;;  %v6387_v10 = vld [vmem:[#allocation139_spill] sm:$0xff] }
  0xb2   : > { %v2153_v40 = vand.u32 4294901760, %v2152_v46  ;;  %v2147_v16 = vand.u32 4294901760, %v2146_v0  ;;  %v2158_v6 = vsub.f32 %v4625_v18, %v6106_v41  ;;  %954 = vmatprep.mubr.f32.mxu1 %v6385_v34  ;;  %v6113_v14 = vand.u32 4294901760, %v6386_v47  ;;  %v6388_v23 = vld [vmem:[#allocation26_spill] sm:$0xff]  ;;  %v6389_v46 = vld [vmem:[#allocation27_spill] sm:$0xff]  ;;  %v6390_v34 = vld [vmem:[#allocation29_spill] sm:$0xff] }
  0xb3   : > { %3287 = vmatpush1.bf16.msra.mxu1 %v3286_v7  ;;  %v2164_v60 = vsub.f32 %v6384_v39, %v6111_v1  ;;  %v6114_v57 = vand.u32 4294901760, %v6387_v10  ;;  %v6115_v29 = vand.u32 4294901760, %v4669_v53  ;;  %v3292_v0 = vpack.c.bf16 %v6389_v46, %v6388_v23  ;;  %v6391_v7 = vld [vmem:[#allocation30_spill] sm:$0xff]  ;;  %v6394_v23 = vld [vmem:[#allocation145_spill] sm:$0xff] }
  0xb4   : > { %v3604_v51 = vpack.c.bf16 %v2153_v40, %v2141_v36  ;;  %v2159_v62 = vand.u32 4294901760, %v2158_v6  ;;  %3289 = vmatprep.subr.bf16.mxu1 %v3288_v52  ;;  %v2176_v41 = vsub.f32 %v6386_v47, %v6113_v14  ;;  %v3294_v18 = vpack.c.bf16 %v6391_v7, %v6390_v34  ;;  %v217_v36 = vld [vmem:[%s5764_s0 + $0x38] sm:$0xff]  ;;  %v6392_v52 = vld [vmem:[#allocation3_spill] sm:$0xff] }
  0xb5   : > { %v2165_v37 = vand.u32 4294901760, %v2164_v60  ;;  %v2170_v1 = vsub.f32 %v6387_v10, %v6114_v57  ;;  %v2182_v39 = vsub.f32 %v4669_v53, %v6115_v29  ;;  %v6120_v40 = vand.u32 4294901760, %v4678_v50  ;;  %v6393_v7 = vld [vmem:[#allocation143_spill] sm:$0xff]  ;;  %v6395_v10 = vld [vmem:[#allocation4_spill] sm:$0xff] }
  0xb6   : > { %3605 = vmatprep.subr.bf16.mxu0 %v3604_v51  ;;  %v3606_v6 = vpack.c.bf16 %v2159_v62, %v2147_v16  ;;  %956 = vmatmul.mubr.f32.vlgmr.msra.gmra.mrb[0].mxu1 %v6392_v52  ;;  %v2177_v14 = vand.u32 4294901760, %v2176_v41  ;;  %v6119_v60 = vand.u32 4294901760, %v4688_v55  ;;  %v6121_v34 = vand.u32 4294901760, %v6393_v7 }
  0xb7   : > { %3291 = vmatpush1.bf16.msra.mxu1 %v3290_v30  ;;  %v2171_v57 = vand.u32 4294901760, %v2170_v1  ;;  %v2183_v46 = vand.u32 4294901760, %v2182_v39  ;;  %v2188_v29 = vsub.f32 %v4678_v50, %v6120_v40  ;;  %v6123_v53 = vand.u32 4294901760, %v6394_v23  ;;  %962 = vmatprep.mubr.f32.mxu1 %v6395_v10  ;;  %v216_v30 = vld [vmem:[%s5764_s0 + $0x30] sm:$0xff] }
  0xb8   : > { %3607 = vmatpush1.bf16.msra.mxu0 %v3606_v6  ;;  %v3608_v62 = vpack.c.bf16 %v2177_v14, %v2165_v37  ;;  %3293 = vmatprep.subr.bf16.mxu1 %v3292_v0  ;;  %v2200_v16 = vsub.f32 %v4688_v55, %v6119_v60  ;;  %v2194_v41 = vsub.f32 %v6393_v7, %v6121_v34  ;;  %v361_v51 = vsel %vm356_vm0, %v217_v36, 0  ;;  %v6396_v14 = vld [vmem:[#allocation32_spill] sm:$0xff]  ;;  %v6397_v0 = vld [vmem:[#allocation33_spill] sm:$0xff]  ;;  %v6399_v34 = vld [vmem:[#allocation35_spill] sm:$0xff] }
  0xb9   : > { %v3610_v39 = vpack.c.bf16 %v2183_v46, %v2171_v57  ;;  %v2189_v1 = vand.u32 4294901760, %v2188_v29  ;;  %v2206_v37 = vsub.f32 %v6394_v23, %v6123_v53  ;;  %v3296_v6 = vpack.c.bf16 %v6397_v0, %v6396_v14  ;;  %v6400_v36 = vld [vmem:[#allocation36_spill] sm:$0xff]  ;;  %v6403_v53 = vld [vmem:[#allocation147_spill] sm:$0xff] }
  0xba   : > { %3609 = vmatprep.subr.bf16.mxu0 %v3608_v62  ;;  %v2201_v60 = vand.u32 4294901760, %v2200_v16  ;;  %v2195_v40 = vand.u32 4294901760, %v2194_v41  ;;  %v5088_v10 = vand.u32 4294901760, %v361_v51  ;;  %v3298_v52 = vpack.c.bf16 %v6400_v36, %v6399_v34  ;;  %v6401_v7 = vld [vmem:[#allocation8_spill] sm:$0xff] }
  0xbb   : > { %964 = vmatmul.mubr.f32.gmra.mrb[2].mxu1 %v6401_v7  ;;  %v2207_v57 = vand.u32 4294901760, %v2206_v37  ;;  %v5093_v29 = vand.u32 4294901760, %v216_v30  ;;  %v6405_v41 = vld [vmem:[#allocation148_spill] sm:$0xff]  ;;  %v6127_v7 = vand.u32 4294901760, %v4741_v4  ;;  %v6407_v23 = vand.u32 4294901760, %v4720_v20 }
  0xbc   : > { %6398 = vst [vmem:[#allocation138_spill] sm:$0xff] %v5088_v10  ;;  %3295 = vmatpush1.bf16.msra.mxu1 %v3294_v18  ;;  %970 = vmatprep.mubr.f32.mxu1 %v6311_v33  ;;  %v3612_v62 = vpack.c.bf16 %v2201_v60, %v2189_v1  ;;  %v5099_v16 = vsub.f32 %v361_v51, %v5088_v10  ;;  %v6126_v36 = vand.u32 4294901760, %v6405_v41  ;;  %v221_v18 = vld [vmem:[%s5764_s0 + $0x58] sm:$0xff] }
  0xbd   : > { %6402 = vst [vmem:[#allocation158_spill] sm:$0xff] %v5093_v29  ;;  %3611 = vmatpush1.bf16.msra.mxu0 %v3610_v39  ;;  %3297 = vmatprep.subr.bf16.mxu1 %v3296_v6  ;;  %v3614_v37 = vpack.c.bf16 %v2207_v57, %v2195_v40  ;;  %v5107_v46 = vsub.f32 %v216_v30, %v5093_v29  ;;  %v6408_v39 = vand.u32 4294901760, %v6403_v53  ;;  %v6409_v30 = vld [vmem:[#allocation38_spill] sm:$0xff]  ;;  %v6410_v57 = vld [vmem:[#allocation39_spill] sm:$0xff] }
  0xbe   : > { %6404 = vst [vmem:[#allocation147_spill] sm:$0xff] %v5099_v16  ;;  %v2212_v60 = vsub.f32 %v4720_v20, %v6407_v23  ;;  %3613 = vmatprep.subr.bf16.mxu0 %v3612_v62  ;;  %v2218_v6 = vsub.f32 %v6405_v41, %v6126_v36  ;;  %v2230_v40 = vsub.f32 %v4741_v4, %v6127_v7  ;;  %v220_v23 = vld [vmem:[%s5764_s0 + $0x50] sm:$0xff]  ;;  %v364_v36 = vsel %vm356_vm0, %v221_v18, 0 }
  0xbf   : > { %6406 = vst [vmem:[#allocation159_spill] sm:$0xff] %v5107_v46  ;;  %v2224_v51 = vsub.f32 %v6403_v53, %v6408_v39  ;;  %v3300_v33 = vpack.c.bf16 %v6410_v57, %v6409_v30  ;;  %972 = vmatmul.mubr.f32.gmra.mrb[4].mxu1 %v6315_v3  ;;  %v6132_v62 = vand.u32 4294901760, %v5107_v46  ;;  %v6411_v7 = vand.u32 4294901760, %v5099_v16  ;;  %v6414_v3 = vld [vmem:[#allocation42_spill] sm:$0xff] }
  0xc0   : > { %3299 = vmatpush1.bf16.msra.mxu1 %v3298_v52  ;;  %v2213_v39 = vand.u32 4294901760, %v2212_v60  ;;  %978 = vmatprep.mubr.f32.mxu1 %v6320_v5  ;;  %v2219_v30 = vand.u32 4294901760, %v2218_v6  ;;  %v2231_v34 = vand.u32 4294901760, %v2230_v40  ;;  %v5134_v0 = vand.u32 4294901760, %v364_v36  ;;  %v6417_v40 = vld [vmem:[#allocation152_spill] sm:$0xff] }
  0xc1   : > { %v2225_v1 = vand.u32 4294901760, %v2224_v51  ;;  %3615 = vmatpush1.bf16.msra.mxu0 %v3614_v37  ;;  %v1971_v57 = vsub.f32 %v5099_v16, %v6411_v7  ;;  %3301 = vmatprep.subr.bf16.mxu1 %v3300_v33  ;;  %v1977_v52 = vsub.f32 %v5107_v46, %v6132_v62  ;;  %v6413_v51 = vld [vmem:[#allocation41_spill] sm:$0xff]  ;;  %v5141_v14 = vand.u32 4294901760, %v220_v23 }
  0xc2   : > { %6412 = vst [vmem:[#allocation160_spill] sm:$0xff] %v5134_v0  ;;  %v3302_v18 = vpack.c.bf16 %v6414_v3, %v6413_v51  ;;  %v3618_v5 = vpack.c.bf16 %v2231_v34, %v2219_v30  ;;  %v5144_v4 = vsub.f32 %v364_v36, %v5134_v0  ;;  %v6133_v7 = vand.u32 4294901760, %v4750_v31  ;;  %v225_v33 = vld [vmem:[%s5764_s0 + $0x78] sm:$0xf]  ;;  %v6424_v51 = vld [vmem:[#allocation47_spill] sm:$0xff] }
  0xc3   : > { %v3616_v60 = vpack.c.bf16 %v2225_v1, %v2213_v39  ;;  %6415 = vst [vmem:[#allocation161_spill] sm:$0xff] %v5141_v14  ;;  %v1972_v37 = vand.u32 4294901760, %v1971_v57  ;;  %980 = vmatmul.mubr.f32.gmra.mrb[6].mxu1 %v6322_v2  ;;  %v1978_v6 = vand.u32 4294901760, %v1977_v52  ;;  %v5152_v1 = vsub.f32 %v220_v23, %v5141_v14  ;;  %v6418_v52 = vld [vmem:[#allocation43_spill] sm:$0xff]  ;;  %v6420_v39 = vld [vmem:[#allocation5_spill] sm:$0xff] }
  0xc4   : > { %6416 = vst [vmem:[#allocation162_spill] sm:$0xff] %v5144_v4  ;;  %3303 = vmatpush1.bf16.msra.mxu1 %v3302_v18  ;;  %v6135_v57 = vand.u32 4294901760, %v6417_v40  ;;  %v6136_v34 = vand.u32 4294901760, %v4767_v63  ;;  %v6142_v36 = vand.u32 4294901760, %v5144_v4  ;;  %v2236_v30 = vsub.f32 %v4750_v31, %v6133_v7  ;;  %v224_v7 = vld [vmem:[%s5764_s0 + $0x70] sm:$0xf]  ;;  %1180 = vmatprep.mubr.f32.mxu1 %v6420_v39 }
  0xc5   : > { %3617 = vmatprep.subr.bf16.mxu0 %v3616_v60  ;;  %1973 = vmatprep.mubr.f32.mxu0 %v1972_v37  ;;  %v6419_v60 = vld [vmem:[#allocation45_spill] sm:$0xff]  ;;  %v367_v37 = vsel %vm356_vm0, %v225_v33, 0  ;;  %v6421_v2 = vand.u32 4294901760, %v4773_v56  ;;  %v6423_v33 = vand.u32 4294901760, %v5152_v1  ;;  %v6425_v39 = vld [vmem:[#allocation48_spill] sm:$0xff] }
  0xc6   : > { %3619 = vmatpush1.bf16.msra.mxu0 %v3618_v5  ;;  %v3304_v18 = vpack.c.bf16 %v6419_v60, %v6418_v52  ;;  %v2248_v62 = vsub.f32 %v6417_v40, %v6135_v57  ;;  %v2242_v5 = vsub.f32 %v4767_v63, %v6136_v34  ;;  %v2237_v23 = vand.u32 4294901760, %v2236_v30 }
  0xc7   : > { %1979 = vmatmul.mubr.f32.gmra.mrb[2].mxu0 %v1978_v6  ;;  %v1987_v6 = vsub.f32 %v5144_v4, %v6142_v36  ;;  %v2254_v57 = vsub.f32 %v4773_v56, %v6421_v2  ;;  %v5181_v60 = vand.u32 4294901760, %v367_v37  ;;  %v1993_v34 = vsub.f32 %v5152_v1, %v6423_v33 }
  0xc8   : > { %3305 = vmatprep.subr.bf16.mxu1 %v3304_v18  ;;  %v2249_v52 = vand.u32 4294901760, %v2248_v62  ;;  %v2243_v3 = vand.u32 4294901760, %v2242_v5  ;;  %v3306_v46 = vpack.c.bf16 %v6425_v39, %v6424_v51  ;;  %v5191_v36 = vand.u32 4294901760, %v224_v7 }
  0xc9   : > { %6422 = vst [vmem:[#allocation152_spill] sm:$0xff] %v5181_v60  ;;  %v1988_v16 = vand.u32 4294901760, %v1987_v6  ;;  %v2255_v41 = vand.u32 4294901760, %v2254_v57  ;;  %v5189_v30 = vsub.f32 %v367_v37, %v5181_v60  ;;  %v1994_v2 = vand.u32 4294901760, %v1993_v34  ;;  %v6426_v37 = vld [vmem:[#allocation49_spill] sm:$0xff]  ;;  %v6427_v6 = vld [vmem:[#allocation51_spill] sm:$0xff] }
  0xca   : > { %v3620_v18 = vpack.c.bf16 %v2249_v52, %v2237_v23  ;;  %3307 = vmatpush1.bf16.msra.mxu1 %v3306_v46  ;;  %v5195_v4 = vsub.f32 %v4781_v25, %v4789_v15  ;;  %v6145_v62 = vand.u32 4294901760, %v4805_v28  ;;  %v5200_v57 = vsub.f32 %v224_v7, %v5191_v36  ;;  %v6428_v34 = vld [vmem:[#allocation52_spill] sm:$0xff]  ;;  %v6429_v52 = vld [vmem:[#allocation54_spill] sm:$0xff]  ;;  %v6431_v23 = vld [vmem:[#allocation57_spill] sm:$0xff] }
  0xcb   : > { %1989 = vmatprep.mubr.f32.mxu0 %v1988_v16  ;;  %v3622_v5 = vpack.c.bf16 %v2255_v41, %v2243_v3  ;;  %v6146_v33 = vand.u32 4294901760, %v5189_v30  ;;  %v3308_v39 = vpack.c.bf16 %v6427_v6, %v6426_v37  ;;  %v3310_v16 = vpack.c.bf16 %v6429_v52, %v6428_v34  ;;  %v6430_v7 = vld [vmem:[#allocation56_spill] sm:$0xff]  ;;  %v6435_v34 = vld [vmem:[#allocation63_spill] sm:$0xff] }
  0xcc   : > { %1995 = vmatmul.mubr.f32.gmra.mrb[4].mxu0 %v1994_v2  ;;  %3621 = vmatprep.subr.bf16.mxu0 %v3620_v18  ;;  %v6149_v46 = vand.u32 4294901760, %v5195_v4  ;;  %v2266_v25 = vsub.f32 %v4805_v28, %v6145_v62  ;;  %v6150_v41 = vand.u32 4294901760, %v5200_v57  ;;  %v3312_v2 = vpack.c.bf16 %v6431_v23, %v6430_v7  ;;  %v6432_v62 = vld [vmem:[#allocation59_spill] sm:$0xff]  ;;  %v6433_v6 = vld [vmem:[#allocation60_spill] sm:$0xff]  ;;  %v6441_v7 = vld [vmem:[#allocation114_spill] sm:$0xff] }
  0xcd   : > { %3623 = vmatpush1.bf16.msra.mxu0 %v3622_v5  ;;  %v2003_v3 = vsub.f32 %v5189_v30, %v6146_v33  ;;  %3309 = vmatprep.subr.bf16.mxu1 %v3308_v39  ;;  %v3314_v37 = vpack.c.bf16 %v6433_v6, %v6432_v62  ;;  %v6434_v33 = vld [vmem:[#allocation61_spill] sm:$0xff]  ;;  %v3632_v23 = vpack.c.bf16 %v4474_v58, %v4471_v13  ;;  %v6440_v62 = vld [vmem:[#allocation10_spill] sm:$0xff]  ;;  %v6489_v58 = vand.u32 4294901760, %v4678_v50 }
  0xce   : > { %v2260_v18 = vsub.f32 %v5195_v4, %v6149_v46  ;;  %3311 = vmatpush1.bf16.msra.mxu1 %v3310_v16  ;;  %v2009_v5 = vsub.f32 %v5200_v57, %v6150_v41  ;;  %v3316_v39 = vpack.c.bf16 %v6435_v34, %v6434_v33  ;;  %v2267_v15 = vand.u32 4294901760, %v2266_v25  ;;  %v6437_v34 = vld [vmem:[#allocation66_spill] sm:$0xff]  ;;  %v6438_v33 = vld [vmem:[#allocation68_spill] sm:$0xff]  ;;  %v6439_v6 = vld [vmem:[#allocation69_spill] sm:$0xff] }
  0xcf   : > { %v2004_v52 = vand.u32 4294901760, %v2003_v3  ;;  %3313 = vmatprep.subr.bf16.mxu1 %v3312_v2  ;;  %v3634_v16 = vpack.c.bf16 %v4496_v42, %v4484_v11  ;;  %v3624_v3 = vpack.c.bf16 %v4388_v19, %v4383_v24  ;;  %v3636_v41 = vpack.c.bf16 %v4517_v12, %v4507_v35  ;;  %v6436_v2 = vld [vmem:[#allocation65_spill] sm:$0xff] }
  0xd0   : > { %v2261_v51 = vand.u32 4294901760, %v2260_v18  ;;  %v2010_v46 = vand.u32 4294901760, %v2009_v5  ;;  %v3318_v18 = vpack.c.bf16 %v6437_v34, %v6436_v2  ;;  %v3638_v25 = vpack.c.bf16 %v4535_v44, %v4529_v45  ;;  %v6442_v34 = vld [vmem:[#allocation70_spill] sm:$0xff]  ;;  %v6444_v2 = vld [vmem:[#allocation9_spill] sm:$0xff] }
  0xd1   : > { %2005 = vmatprep.mubr.f32.mxu0 %v2004_v52  ;;  %v3320_v52 = vpack.c.bf16 %v6439_v6, %v6438_v33  ;;  %v6445_v6 = vld [vmem:[#allocation74_spill] sm:$0xff]  ;;  %v6446_v33 = vld [vmem:[#allocation75_spill] sm:$0xff] }
  0xd2   : > { %2262 = vmatprep.subr.mxu0 %v2261_v51  ;;  %3315 = vmatpush1.bf16.msra.mxu1 %v3314_v37  ;;  %v3626_v51 = vpack.c.bf16 %v4412_v49, %v6441_v7  ;;  %v3628_v37 = vpack.c.bf16 %v4433_v17, %v4427_v43  ;;  %v3324_v5 = vpack.c.bf16 %v6446_v33, %v6445_v6  ;;  %v6447_v33 = vld [vmem:[#allocation106_spill] sm:$0xff]  ;;  %v6455_v6 = vand.u32 4294901760, %v4507_v35 }
  0xd3   : > { %2011 = vmatmul.mubr.f32.gmra.mrb[6].mxu0 %v2010_v46  ;;  %3317 = vmatprep.subr.bf16.mxu1 %v3316_v39  ;;  %v6443_v46 = vld [vmem:[#allocation72_spill] sm:$0xff]  ;;  %v6466_v35 = vand.u32 4294901760, %v4571_v38 }
  0xd4   : > { %2268 = vmatpush1.msra.mxu0 %v2267_v15  ;;  %2292 = vmatprep.mubr.f32.mxu0 %v6440_v62  ;;  %v3322_v39 = vpack.c.bf16 %v6443_v46, %v6442_v34  ;;  %v3340_v15 = vpack.c.bf16 %v4326_v22, %v4324_v26  ;;  %v6449_v26 = vld [vmem:[#allocation110_spill] sm:$0xff]  ;;  %v6450_v46 = vld [vmem:[#allocation112_spill] sm:$0xff]  ;;  %v6456_v22 = vand.u32 4294901760, %v4517_v12  ;;  %v6459_v34 = vand.u32 4294901760, %v4535_v44 }
  0xd5   : > { %3625 = vmatprep.subr.bf16.mxu0 %v3624_v3  ;;  %v3630_v3 = vpack.c.bf16 %v4451_v61, %v4445_v32 }
  0xd6   : > { %3319 = vmatpush1.bf16.msra.mxu1 %v3318_v18  ;;  %v3344_v18 = vpack.c.bf16 %v6371_v27, %v6370_v9  ;;  %v6453_v9 = vld [vmem:[#allocation79_spill] sm:$0xff]  ;;  %v5280_v42 = vpack.c.bf16 %v6456_v22, %v6455_v6  ;;  %v6467_v22 = vand.u32 4294901760, %v4583_v8  ;;  %v6469_v6 = vld [vmem:[#allocation130_spill] sm:$0xff] }
  0xd7   : > { %2294 = vmatmul.mubr.f32.vlgmr.msra.gmra.mrb[0].mxu0 %v6444_v2  ;;  %3321 = vmatprep.subr.bf16.mxu1 %v3320_v52  ;;  %v6452_v2 = vld [vmem:[#allocation78_spill] sm:$0xff]  ;;  %v6454_v52 = vld [vmem:[#allocation81_spill] sm:$0xff] }
  0xd8   : > { %3627 = vmatpush1.bf16.msra.mxu0 %v3626_v51  ;;  %2300 = vmatprep.mubr.f32.mxu0 %v5088_v10  ;;  %v6448_v51 = vld [vmem:[#allocation109_spill] sm:$0xff]  ;;  %6457 = vst [vmem:[#allocation114_spill] sm:$0xff] %v5280_v42  ;;  %v5299_v12 = vpack.c.bf16 %v6467_v22, %v6466_v35  ;;  %v6484_v35 = vld [vmem:[#allocation84_spill] sm:$0xff] }
  0xd9   : > { %3629 = vmatprep.subr.bf16.mxu0 %v3628_v37  ;;  %v3348_v62 = vpack.c.bf16 %v6448_v51, %v6375_v59  ;;  %v6451_v10 = vld [vmem:[#allocation77_spill] sm:$0xff]  ;;  %v3328_v37 = vpack.c.bf16 %v6454_v52, %v6453_v9  ;;  %v6463_v52 = vld [vmem:[#allocation128_spill] sm:$0xff] }
  0xda   : > { %3323 = vmatpush1.bf16.msra.mxu1 %v3322_v39  ;;  %v3326_v27 = vpack.c.bf16 %v6452_v2, %v6451_v10  ;;  %v6458_v39 = vand.u32 4294901760, %v4529_v45  ;;  %v6464_v9 = vand.u32 4294901760, %v6463_v52  ;;  %6468 = vst [vmem:[#allocation128_spill] sm:$0xff] %v5299_v12  ;;  %v6471_v45 = vld [vmem:[#allocation132_spill] sm:$0xff]  ;;  %v6476_v10 = vld [vmem:[#allocation135_spill] sm:$0xff] }
  0xdb   : > { %3325 = vmatprep.subr.bf16.mxu1 %v3324_v5  ;;  %2302 = vmatmul.mubr.f32.gmra.mrb[2].mxu0 %v5093_v29  ;;  %v6461_v5 = vld [vmem:[#allocation127_spill] sm:$0xff]  ;;  %v6477_v29 = vand.u32 4294901760, %v6476_v10 }
  0xdc   : > { %3631 = vmatpush1.bf16.msra.mxu0 %v3630_v3  ;;  %2308 = vmatprep.mubr.f32.mxu0 %v5134_v0  ;;  %v5287_v51 = vpack.c.bf16 %v6459_v34, %v6458_v39  ;;  %v6462_v59 = vand.u32 4294901760, %v6461_v5  ;;  %v6470_v3 = vand.u32 4294901760, %v6469_v6  ;;  %v6472_v0 = vand.u32 4294901760, %v6471_v45  ;;  %v6474_v34 = vld [vmem:[#allocation133_spill] sm:$0xff]  ;;  %v6485_v12 = vld [vmem:[#allocation139_spill] sm:$0xff] }
  0xdd   : > { %3633 = vmatprep.subr.bf16.mxu0 %v3632_v23  ;;  %v6475_v39 = vand.u32 4294901760, %v6474_v34  ;;  %v6483_v23 = vld [vmem:[#allocation83_spill] sm:$0xff]  ;;  %v6486_v11 = vand.u32 4294901760, %v6485_v12 }
  0xde   : > { %6460 = vst [vmem:[#allocation163_spill] sm:$0xff] %v5287_v51  ;;  %v5293_v2 = vpack.c.bf16 %v6464_v9, %v6462_v59  ;;  %v5305_v44 = vpack.c.bf16 %v6472_v0, %v6470_v3  ;;  %v6479_v9 = vld [vmem:[#allocation137_spill] sm:$0xff]  ;;  %3327 = vmatpush1.bf16.msra.mxu1 %v3326_v27  ;;  %v3330_v22 = vpack.c.bf16 %v6484_v35, %v6483_v23  ;;  %v6493_v27 = vld [vmem:[#allocation143_spill] sm:$0xff] }
  0xdf   : > { %v5311_v51 = vpack.c.bf16 %v6477_v29, %v6475_v39  ;;  %v6480_v59 = vand.u32 4294901760, %v6479_v9  ;;  %v6487_v0 = vld [vmem:[#allocation141_spill] sm:$0xff]  ;;  %v6490_v29 = vand.u32 4294901760, %v4688_v55  ;;  %3329 = vmatprep.subr.bf16.mxu1 %v3328_v37  ;;  %2310 = vmatmul.mubr.f32.gmra.mrb[4].mxu0 %v5141_v14  ;;  %v6494_v35 = vand.u32 4294901760, %v6493_v27  ;;  %v6501_v37 = vld [vmem:[#allocation148_spill] sm:$0xff] }
  0xe0   : > { %6465 = vst [vmem:[#allocation127_spill] sm:$0xff] %v5293_v2  ;;  %6473 = vst [vmem:[#allocation130_spill] sm:$0xff] %v5305_v44  ;;  %v6481_v2 = vand.u32 4294901760, %v6386_v47  ;;  %v6488_v3 = vand.u32 4294901760, %v6487_v0  ;;  %v6495_v23 = vld [vmem:[#allocation145_spill] sm:$0xff]  ;;  %3635 = vmatpush1.bf16.msra.mxu0 %v3634_v16  ;;  %2316 = vmatprep.mubr.f32.mxu0 %v5181_v60  ;;  %v6506_v16 = vand.u32 4294901760, %v4750_v31 }
  0xe1   : > { %6478 = vst [vmem:[#allocation132_spill] sm:$0xff] %v5311_v51  ;;  %v5331_v39 = vpack.c.bf16 %v6490_v29, %v6489_v58  ;;  %v6491_v51 = vld [vmem:[#allocation85_spill] sm:$0xff]  ;;  %v6499_v58 = vand.u32 4294901760, %v6403_v53  ;;  %v6502_v29 = vand.u32 4294901760, %v6501_v37  ;;  %3637 = vmatprep.subr.bf16.mxu0 %v3636_v41  ;;  %v6512_v41 = vld [vmem:[#allocation92_spill] sm:$0xff] }
  0xe2   : > { %v5317_v42 = vpack.c.bf16 %v6481_v2, %v6480_v59  ;;  %v5325_v44 = vpack.c.bf16 %v6488_v3, %v6486_v11  ;;  %v6492_v2 = vld [vmem:[#allocation87_spill] sm:$0xff]  ;;  %v6498_v11 = vand.u32 4294901760, %v4720_v20  ;;  %3331 = vmatpush1.bf16.msra.mxu1 %v3330_v22 }
  0xe3   : > { %v3332_v59 = vpack.c.bf16 %v6492_v2, %v6491_v51  ;;  %v6503_v2 = vld [vmem:[#allocation150_spill] sm:$0xff]  ;;  %2318 = vmatmul.mubr.f32.gmra.mrb[6].mxu0 %v5191_v36 }
  0xe4   : > { %6482 = vst [vmem:[#allocation133_spill] sm:$0xff] %v5317_v42  ;;  %v6496_v42 = vand.u32 4294901760, %v6495_v23  ;;  %v5347_v3 = vpack.c.bf16 %v6499_v58, %v6498_v11  ;;  %v6504_v51 = vand.u32 4294901760, %v6503_v2  ;;  %v6509_v11 = vand.u32 4294901760, %v4773_v56  ;;  %3639 = vmatpush1.bf16.msra.mxu0 %v3638_v25 }
  0xe5   : > { %3333 = vmatprep.subr.bf16.mxu1 %v3332_v59  ;;  %v6517_v59 = vpack.c.bf16 %v4583_v8, %v4571_v38  ;;  %v3648_v25 = vpack.c.bf16 %v6386_v47, %v6479_v9  ;;  %v6518_v8 = vpack.c.bf16 %v6368_v54, %v4329_v48  ;;  %v3654_v38 = vpack.c.bf16 %v6495_v23, %v6493_v27  ;;  %v6528_v9 = vld [vmem:[#allocation16_spill] sm:$0xff]  ;;  %v6534_v27 = vld [vmem:[#allocation115_spill] sm:$0xff] }
  0xe6   : > { %v5340_v13 = vpack.c.bf16 %v6496_v42, %v6494_v35  ;;  %6500 = vst [vmem:[#allocation137_spill] sm:$0xff] %v5347_v3  ;;  %v5353_v14 = vpack.c.bf16 %v6504_v51, %v6502_v29  ;;  %v3640_v42 = vpack.c.bf16 %v6463_v52, %v6461_v5  ;;  %v6507_v35 = vand.u32 4294901760, %v6417_v40  ;;  %v6510_v3 = vld [vmem:[#allocation88_spill] sm:$0xff]  ;;  %v6511_v51 = vld [vmem:[#allocation90_spill] sm:$0xff]  ;;  %v6514_v5 = vld [vmem:[#allocation17_spill] sm:$0xff] }
  0xe7   : > { %v3334_v29 = vpack.c.bf16 %v6511_v51, %v6510_v3  ;;  %2474 = vmatprep.mubr.f32.mxu0 %v6514_v5  ;;  %v3656_v47 = vpack.c.bf16 %v6403_v53, %v4720_v20  ;;  %v6522_v53 = vpack.c.bf16 %v6417_v40, %v4750_v31  ;;  %v6523_v20 = vld [vmem:[#allocation6_spill] sm:$0xff]  ;;  %v6529_v23 = vld [vmem:[#allocation28_spill] sm:$0xff]  ;;  %v6531_v40 = vld [vmem:[#allocation31_spill] sm:$0xff] }
  0xe8   : > { %6497 = vst [vmem:[#allocation135_spill] sm:$0xff] %v5340_v13  ;;  %6505 = vst [vmem:[#allocation139_spill] sm:$0xff] %v5353_v14  ;;  %v5361_v60 = vpack.c.bf16 %v6507_v35, %v6506_v16  ;;  %v6508_v13 = vand.u32 4294901760, %v4767_v63  ;;  %v6513_v14 = vld [vmem:[#allocation93_spill] sm:$0xff]  ;;  %3641 = vmatprep.subr.bf16.mxu0 %v3640_v42  ;;  %v3644_v16 = vpack.c.bf16 %v6471_v45, %v6469_v6  ;;  %v6516_v35 = vld [vmem:[#allocation96_spill] sm:$0xff] }
  0xe9   : > { %v3336_v52 = vpack.c.bf16 %v6513_v14, %v6512_v41  ;;  %3335 = vmatpush1.bf16.msra.mxu1 %v3334_v29  ;;  %3643 = vmatpush1.bf16.msra.mxu0 %v6517_v59  ;;  %v3650_v6 = vpack.c.bf16 %v6487_v0, %v6485_v12  ;;  %v3652_v45 = vpack.c.bf16 %v4688_v55, %v4678_v50  ;;  %v6526_v12 = vld [vmem:[#allocation25_spill] sm:$0xff]  ;;  %v6530_v31 = vld [vmem:[#allocation18_spill] sm:$0xff]  ;;  %v6538_v42 = vld [vmem:[#allocation147_spill] sm:$0xff] }
  0xea   : > { %v5367_v58 = vpack.c.bf16 %v6509_v11, %v6508_v13  ;;  %v6515_v13 = vld [vmem:[#allocation95_spill] sm:$0xff]  ;;  %v3646_v11 = vpack.c.bf16 %v6476_v10, %v6474_v34  ;;  %3645 = vmatprep.subr.bf16.mxu0 %v3644_v16  ;;  %v6519_v10 = vpack.c.bf16 %v6447_v33, %v4350_v21  ;;  %v3658_v50 = vpack.c.bf16 %v6503_v2, %v6501_v37  ;;  %v6532_v0 = vld [vmem:[#allocation113_spill] sm:$0xff]  ;;  %v6541_v16 = vld [vmem:[#allocation156_spill] sm:$0xff] }
  0xeb   : > { %v3338_v22 = vpack.c.bf16 %v6516_v35, %v6515_v13  ;;  %3337 = vmatprep.subr.bf16.mxu1 %v3336_v52  ;;  %v6520_v55 = vpack.c.bf16 %v6450_v46, %v6449_v26  ;;  %v6527_v34 = vpack.c.bf16 %v4773_v56, %v4767_v63  ;;  %v6533_v2 = vld [vmem:[#allocation15_spill] sm:$0xff]  ;;  %v6535_v63 = vld [vmem:[#allocation34_spill] sm:$0xff]  ;;  %v6536_v56 = vld [vmem:[#allocation116_spill] sm:$0xff] }
  0xec   : > { %v6537_v37 = vld [vmem:[#allocation37_spill] sm:$0xff]  ;;  %v6540_v52 = vld [vmem:[#allocation159_spill] sm:$0xff]  ;;  %v6543_v59 = vld [vmem:[#allocation40_spill] sm:$0xff] }
  0xed   : > { %3339 = vmatpush1.bf16.msra.mxu1 %v3338_v22  ;;  %3647 = vmatpush1.bf16.msra.mxu0 %v3646_v11  ;;  %v6539_v29 = vld [vmem:[#allocation101_spill] sm:$0xff]  ;;  %v6544_v11 = vld [vmem:[#allocation118_spill] sm:$0xff] }
  0xee   : > { %3341 = vmatprep.subr.bf16.mxu1 %v3340_v15  ;;  %3649 = vmatprep.subr.bf16.mxu0 %v3648_v25  ;;  %v6521_v15 = vld [vmem:[#allocation19_spill] sm:$0xff]  ;;  %v6542_v22 = vld [vmem:[#allocation117_spill] sm:$0xff]  ;;  %v6545_v25 = vld [vmem:[#allocation44_spill] sm:$0xff] }
  0xef   : > { %v6576_v46 = vld [vmem:[#allocation82_spill] sm:$0xff] }
  0xf0   : > { %v6578_v26 = vld [vmem:[#allocation86_spill] sm:$0xff] }
  0xf1   : > { %3343 = vmatpush1.bf16.msra.mxu1 %v6518_v8  ;;  %3651 = vmatpush1.bf16.msra.mxu0 %v3650_v6  ;;  %v6546_v6 = vld [vmem:[#allocation162_spill] sm:$0xff]  ;;  %v6548_v8 = vld [vmem:[#allocation5_spill] sm:$0xff] }
  0xf2   : > { %3345 = vmatprep.subr.bf16.mxu1 %v3344_v18  ;;  %3653 = vmatprep.subr.bf16.mxu0 %v3652_v45  ;;  %v6524_v18 = vld [vmem:[#allocation23_spill] sm:$0xff]  ;;  %v6547_v45 = vld [vmem:[#allocation157_spill] sm:$0xff] }
  0xf5   : > { %3347 = vmatpush1.bf16.msra.mxu1 %v6519_v10  ;;  %3655 = vmatpush1.bf16.msra.mxu0 %v3654_v38  ;;  %v6549_v38 = vand.u32 4294901760, %v6548_v8  ;;  %v6551_v10 = vld [vmem:[#allocation46_spill] sm:$0xff]  ;;  %v335_v8 = vld [vmem:[%s5765_s1 + $0x18] sm:$0xf] }
  0xf6   : > { %3349 = vmatprep.subr.bf16.mxu1 %v3348_v62  ;;  %3657 = vmatprep.subr.bf16.mxu0 %v3656_v47  ;;  %v6525_v62 = vld [vmem:[#allocation7_spill] sm:$0xff]  ;;  %v6550_v47 = vld [vmem:[#allocation122_spill] sm:$0xff] }
  0xf9   : > { %3351 = vmatpush1.bf16.msra.mxu1 %v6520_v55  ;;  %3659 = vmatpush1.bf16.msra.mxu0 %v3658_v50  ;;  %v6552_v50 = vld [vmem:[#allocation124_spill] sm:$0xff]  ;;  %v6553_v55 = vld [vmem:[#allocation50_spill] sm:$0xff] }
  0xfa   : > { %3353 = vmatprep.subr.bf16.mxu1 %v6521_v15  ;;  %3661 = vmatprep.subr.bf16.mxu0 %v6522_v53  ;;  %v332_v15 = vld [vmem:[%s5765_s1] sm:$0xff]  ;;  %v3936_v53 = vmov 0  }
  0xfb   : > { %3906 = vset.pattern.permute.xlu0 %v3936_v53  ;;  %3907 = vset.pattern.permute.xlu1 %v3936_v53  ;;  %v6566_v53 = vld [vmem:[#allocation67_spill] sm:$0xff] }
  0xfc   : > { %1183 = vmatmul.mubr.f32.vlgmr.msra.gmra.mrb[0].mxu1 %v6523_v20  ;;  %338 = vperm.xlu0 %3906, %v332_v15   ;;  %v6565_v15 = vld [vmem:[#allocation136_spill] sm:$0xff] }
  0xfd   : > { %3355 = vmatpush1.bf16.msra.mxu1 %v6524_v18  ;;  %1190 = vmatprep.mubr.f32.mxu1 %v6525_v62  ;;  %v6554_v18 = vld [vmem:[#allocation125_spill] sm:$0xff] }
  0xfe   : > { %3357 = vmatprep.subr.bf16.mxu1 %v6526_v12  ;;  %3663 = vmatpush1.bf16.msra.mxu0 %v6527_v34  ;;  %v6555_v12 = vld [vmem:[#allocation53_spill] sm:$0xff]  ;;  %v333_v34 = vld [vmem:[%s5765_s1 + $0x8] sm:$0xff] }
  0xff   : > { %2446 = vmatprep.subr.mxu0 %v5195_v4 }
 0x100   : > { %1193 = vmatmul.mubr.f32.gmra.mrb[2].mxu1 %v6528_v9  ;;  %343 = vperm.xlu0 %3906, %v333_v34   ;;  %v6568_v34 = vld [vmem:[#allocation71_spill] sm:$0xff] }
 0x101   : > { %3359 = vmatpush1.bf16.msra.mxu1 %v6529_v23  ;;  %1200 = vmatprep.mubr.f32.mxu1 %v6530_v31  ;;  %v334_v23 = vld [vmem:[%s5765_s1 + $0x10] sm:$0xff] }
 0x102   : > { %3361 = vmatprep.subr.bf16.mxu1 %v6531_v40  ;;  %2449 = vmatpush1.msra.mxu0 %v4805_v28  ;;  %v6556_v40 = vld [vmem:[#allocation126_spill] sm:$0xff] }
 0x103   : > { %3665 = vmatprep.subr.bf16.mxu0 %v6532_v0  ;;  %2477 = vmatmul.mubr.f32.vlgmr.msra.gmra.mrb[0].mxu0 %v6533_v2 }
 0x104   : > { %3667 = vmatpush1.bf16.msra.mxu0 %v6534_v27  ;;  %2484 = vmatprep.mubr.f32.mxu0 %v6538_v42 }
 0x105   : > { %3363 = vmatpush1.bf16.msra.mxu1 %v6535_v63  ;;  %3669 = vmatprep.subr.bf16.mxu0 %v6536_v56  ;;  %v6557_v63 = vld [vmem:[#allocation55_spill] sm:$0xff] }
 0x106   : > { %3365 = vmatprep.subr.bf16.mxu1 %v6537_v37  ;;  %1203 = vmatmul.mubr.f32.gmra.mrb[4].mxu1 %v6539_v29  ;;  %v6558_v37 = vand.u32 4294901760, %v6514_v5  ;;  %v6564_v5 = vld [vmem:[#allocation64_spill] sm:$0xff] }
 0x107   : > { %2487 = vmatmul.mubr.f32.gmra.mrb[2].mxu0 %v6540_v52  ;;  %1210 = vmatprep.mubr.f32.mxu1 %v6541_v16 }
 0x108   : > { %3671 = vmatpush1.bf16.msra.mxu0 %v6542_v22  ;;  %2494 = vmatprep.mubr.f32.mxu0 %v6546_v6 }
 0x109   : > { %3367 = vmatpush1.bf16.msra.mxu1 %v6543_v59  ;;  %3673 = vmatprep.subr.bf16.mxu0 %v6544_v11  ;;  %v6559_v59 = vld [vmem:[#allocation129_spill] sm:$0xff] }
 0x10a   : > { %3369 = vmatprep.subr.bf16.mxu1 %v6545_v25  ;;  %1213 = vmatmul.mubr.f32.gmra.mrb[6].mxu1 %v6547_v45  ;;  %v6560_v25 = vld [vmem:[#allocation58_spill] sm:$0xff] }
 0x10b   : > { %2497 = vmatmul.mubr.f32.gmra.mrb[4].mxu0 %v5152_v1  ;;  %1350 = vmatprep.mubr.f32.mxu1 %v6549_v38  ;;  %v6561_v38 = vld [vmem:[#allocation131_spill] sm:$0xff] }
 0x10c   : > { %3675 = vmatpush1.bf16.msra.mxu0 %v6550_v47  ;;  %2504 = vmatprep.mubr.f32.mxu0 %v5189_v30 }
 0x10d   : > { %3371 = vmatpush1.bf16.msra.mxu1 %v6551_v10  ;;  %3677 = vmatprep.subr.bf16.mxu0 %v6552_v50  ;;  %v6562_v10 = vld [vmem:[#allocation62_spill] sm:$0xff] }
 0x10e   : > { %3373 = vmatprep.subr.bf16.mxu1 %v6553_v55  ;;  %348 = vperm.xlu1 %3907, %v334_v23   ;;  %v6563_v55 = vld [vmem:[#allocation134_spill] sm:$0xff] }
 0x10f   : > { %2507 = vmatmul.mubr.f32.gmra.mrb[6].mxu0 %v5200_v57  ;;  %v6569_v23 = vld [vmem:[#allocation142_spill] sm:$0xff] }
 0x110   : > { %3679 = vmatpush1.bf16.msra.mxu0 %v6554_v18  ;;  %2622 = vmatprep.mubr.f32.mxu0 %v6558_v37  ;;  %v6571_v37 = vld [vmem:[#allocation144_spill] sm:$0xff] }
 0x111   : > { %3375 = vmatpush1.bf16.msra.mxu1 %v6555_v12  ;;  %3681 = vmatprep.subr.bf16.mxu0 %v6556_v40  ;;  %v6567_v12 = vld [vmem:[#allocation140_spill] sm:$0xff] }
 0x112   : > { %3377 = vmatprep.subr.bf16.mxu1 %v6557_v63  ;;  %353 = vperm.xlu1 %3907, %v335_v8   ;;  %v6570_v63 = vld [vmem:[#allocation73_spill] sm:$0xff]  ;;  %v6573_v8 = vld [vmem:[#allocation146_spill] sm:$0xff] }
 0x114   : > { %3683 = vmatpush1.bf16.msra.mxu0 %v6559_v59 }
 0x115   : > { %3379 = vmatpush1.bf16.msra.mxu1 %v6560_v25  ;;  %3685 = vmatprep.subr.bf16.mxu0 %v6561_v38  ;;  %v6572_v25 = vld [vmem:[#allocation76_spill] sm:$0xff] }
 0x116   : > { %3381 = vmatprep.subr.bf16.mxu1 %v6562_v10  ;;  %v6574_v10 = vld [vmem:[#allocation80_spill] sm:$0xff] }
 0x118   : > { %3687 = vmatpush1.bf16.msra.mxu0 %v6563_v55 }
 0x119   : > { %3383 = vmatpush1.bf16.msra.mxu1 %v6564_v5  ;;  %3689 = vmatprep.subr.bf16.mxu0 %v6565_v15  ;;  %v6575_v5 = vld [vmem:[#allocation149_spill] sm:$0xff] }
 0x11a   : > { %3385 = vmatprep.subr.bf16.mxu1 %v6566_v53  ;;  %v6577_v53 = vld [vmem:[#allocation151_spill] sm:$0xff] }
 0x11c   : > { %3691 = vmatpush1.bf16.msra.mxu0 %v6567_v12 }
 0x11d   : > { %3387 = vmatpush1.bf16.msra.mxu1 %v6568_v34  ;;  %3693 = vmatprep.subr.bf16.mxu0 %v6569_v23  ;;  %v6579_v34 = vld [vmem:[#allocation153_spill] sm:$0xff] }
 0x11e   : > { %3389 = vmatprep.subr.bf16.mxu1 %v6570_v63  ;;  %v6580_v23 = vld [vmem:[#allocation89_spill] sm:$0xff]  ;;  %v6581_v63 = vld [vmem:[#allocation154_spill] sm:$0xff] }
 0x120   : > { %3695 = vmatpush1.bf16.msra.mxu0 %v6571_v37 }
 0x121   : > { %3391 = vmatpush1.bf16.msra.mxu1 %v6572_v25  ;;  %3697 = vmatprep.subr.bf16.mxu0 %v6573_v8  ;;  %v6582_v25 = vand.u32 4294901760, %v4383_v24  ;;  %v6583_v8 = vand.u32 4294901760, %v4388_v19  ;;  %v6591_v19 = vand.u32 4294901760, %v6533_v2  ;;  %v6592_v24 = vand.u32 4294901760, %v4445_v32  ;;  %v6601_v2 = vld [vmem:[#allocation103_spill] sm:$0xff] }
 0x122   : > { %3393 = vmatprep.subr.bf16.mxu1 %v6574_v10  ;;  %v6584_v10 = vld [vmem:[#allocation91_spill] sm:$0xff]  ;;  %v6602_v32 = vand.u32 4294901760, %v6540_v52 }
 0x123   : > { %v3704_v37 = vpack.c.bf16 %v6583_v8, %v6582_v25  ;;  %v6594_v8 = vld [vmem:[#allocation97_spill] sm:$0xff] }
 0x124   : > { %3699 = vmatpush1.bf16.msra.mxu0 %v6575_v5  ;;  %v6585_v5 = vand.u32 4294901760, %v6441_v7  ;;  %v6593_v7 = vand.u32 4294901760, %v4451_v61  ;;  %v6603_v61 = vld [vmem:[#allocation121_spill] sm:$0xff] }
 0x125   : > { %3395 = vmatpush1.bf16.msra.mxu1 %v6576_v46  ;;  %3701 = vmatprep.subr.bf16.mxu0 %v6577_v53  ;;  %v6586_v46 = vand.u32 4294901760, %v4412_v49 }
 0x126   : > { %3397 = vmatprep.subr.bf16.mxu1 %v6578_v26  ;;  %v6587_v26 = vand.u32 4294901760, %v4427_v43  ;;  %v3710_v49 = vpack.c.bf16 %v6593_v7, %v6592_v24  ;;  %v6595_v43 = vld [vmem:[#allocation119_spill] sm:$0xff]  ;;  %v6610_v24 = vld [vmem:[#allocation20_spill] sm:$0xff] }
 0x127   : > { %v3706_v53 = vpack.c.bf16 %v6586_v46, %v6585_v5  ;;  %v6597_v5 = vld [vmem:[#allocation120_spill] sm:$0xff]  ;;  %v6611_v7 = vand.u32 4294901760, %v6610_v24 }
 0x128   : > { %3703 = vmatpush1.bf16.msra.mxu0 %v6579_v34  ;;  %v6588_v34 = vand.u32 4294901760, %v4433_v17  ;;  %v6596_v17 = vand.u32 4294901760, %v6595_v43 }
 0x129   : > { %3399 = vmatpush1.bf16.msra.mxu1 %v6580_v23  ;;  %2594 = vmatprep.subr.mxu0 %v6581_v63  ;;  %v6589_v23 = vld [vmem:[#allocation155_spill] sm:$0xff]  ;;  %v6590_v63 = vld [vmem:[#allocation94_spill] sm:$0xff] }
 0x12a   : > { %3401 = vmatprep.subr.bf16.mxu1 %v6584_v10  ;;  %v3708_v33 = vpack.c.bf16 %v6588_v34, %v6587_v26  ;;  %v6598_v34 = vand.u32 4294901760, %v6597_v5  ;;  %v6605_v10 = vld [vmem:[#allocation123_spill] sm:$0xff]  ;;  %v6607_v26 = vand.u32 4294901760, %v6546_v6  ;;  %v6616_v5 = vld [vmem:[#allocation114_spill] sm:$0xff] }
 0x12b   : > { %v6617_v6 = vld [vmem:[#allocation111_spill] sm:$0xff] }
 0x12c   : > { %2596 = vmatpush1.msra.mxu0 %v6589_v23  ;;  %v3712_v25 = vpack.c.bf16 %v6598_v34, %v6596_v17  ;;  %v6615_v17 = vand.u32 4294901760, %v5189_v30  ;;  %v6618_v34 = vld [vmem:[#allocation22_spill] sm:$0xff]  ;;  %v6627_v30 = vld [vmem:[#allocation163_spill] sm:$0xff] }
 0x12d   : > { %3403 = vmatpush1.bf16.msra.mxu1 %v6590_v63  ;;  %3705 = vmatprep.subr.bf16.mxu0 %v3704_v37  ;;  %v6599_v63 = vand.u32 4294901760, %v6538_v42  ;;  %v6600_v37 = vld [vmem:[#allocation100_spill] sm:$0xff] }
 0x12e   : > { %2626 = vmatmul.mubr.f32.vlgmr.msra.gmra.mrb[0].mxu0 %v6591_v19  ;;  %3405 = vmatprep.subr.bf16.mxu1 %v6594_v8  ;;  %v6608_v19 = vld [vmem:[#allocation105_spill] sm:$0xff]  ;;  %v6609_v42 = vld [vmem:[#allocation108_spill] sm:$0xff] }
 0x12f   : > { %3707 = vmatpush1.bf16.msra.mxu0 %v3706_v53  ;;  %2634 = vmatprep.mubr.f32.mxu0 %v6599_v63  ;;  %v6604_v53 = vand.u32 4294901760, %v6603_v61  ;;  %v6612_v8 = vld [vmem:[#allocation21_spill] sm:$0xff]  ;;  %v6620_v63 = vld [vmem:[#allocation24_spill] sm:$0xff] }
 0x130   : > { %3709 = vmatprep.subr.bf16.mxu0 %v3708_v33  ;;  %v6606_v33 = vand.u32 4294901760, %v6605_v10  ;;  %v6613_v43 = vand.u32 4294901760, %v6612_v8 }
 0x131   : > { %3407 = vmatpush1.bf16.msra.mxu1 %v6600_v37  ;;  %v6621_v37 = vand.u32 4294901760, %v6620_v63  ;;  %v6643_v63 = vld [vmem:[#allocation35_spill] sm:$0xff] }
 0x132   : > { %3409 = vmatprep.subr.bf16.mxu1 %v6601_v2  ;;  %2638 = vmatmul.mubr.f32.gmra.mrb[2].mxu0 %v6602_v32  ;;  %v3714_v46 = vpack.c.bf16 %v6606_v33, %v6604_v53  ;;  %v3416_v52 = vpack.c.bf16 %v6613_v43, %v6611_v7  ;;  %v6622_v32 = vld [vmem:[#allocation26_spill] sm:$0xff]  ;;  %v6624_v53 = vld [vmem:[#allocation27_spill] sm:$0xff]  ;;  %v6626_v33 = vand.u32 4294901760, %v5200_v57  ;;  %v6636_v57 = vld [vmem:[#allocation32_spill] sm:$0xff] }
 0x133   : > { %3711 = vmatpush1.bf16.msra.mxu0 %v3710_v49  ;;  %2646 = vmatprep.mubr.f32.mxu0 %v6607_v26  ;;  %v6614_v49 = vand.u32 4294901760, %v5152_v1  ;;  %v6623_v61 = vand.u32 4294901760, %v6622_v32  ;;  %v6625_v10 = vand.u32 4294901760, %v6624_v53  ;;  %v6629_v26 = vld [vmem:[#allocation127_spill] sm:$0xff]  ;;  %v6633_v7 = vld [vmem:[#allocation30_spill] sm:$0xff] }
 0x134   : > { %3713 = vmatprep.subr.bf16.mxu0 %v3712_v25  ;;  %v6619_v25 = vand.u32 4294901760, %v6618_v34  ;;  %v6634_v8 = vand.u32 4294901760, %v6633_v7  ;;  %v6640_v34 = vld [vmem:[#allocation128_spill] sm:$0xff]  ;;  %v6648_v53 = vld [vmem:[#allocation38_spill] sm:$0xff] }
 0x135   : > { %3411 = vmatpush1.bf16.msra.mxu1 %v6608_v19  ;;  %v3420_v1 = vpack.c.bf16 %v6625_v10, %v6623_v61  ;;  %v6630_v19 = vand.u32 4294901760, %v6523_v20  ;;  %v6642_v20 = vand.u32 4294901760, %v6528_v9  ;;  %v6647_v61 = vand.u32 4294901760, %v6530_v31  ;;  %v6657_v7 = vld [vmem:[#allocation42_spill] sm:$0xff] }
 0x136   : > { %3413 = vmatprep.subr.bf16.mxu1 %v6609_v42  ;;  %2650 = vmatmul.mubr.f32.gmra.mrb[4].mxu0 %v6614_v49  ;;  %v3418_v2 = vpack.c.bf16 %v6621_v37, %v6619_v25  ;;  %v6631_v42 = vld [vmem:[#allocation29_spill] sm:$0xff]  ;;  %v6637_v49 = vand.u32 4294901760, %v6636_v57  ;;  %v6641_v25 = vld [vmem:[#allocation130_spill] sm:$0xff]  ;;  %v6644_v37 = vand.u32 4294901760, %v6643_v63  ;;  %v6649_v10 = vand.u32 4294901760, %v6648_v53 }
 0x137   : > { %3715 = vmatpush1.bf16.msra.mxu0 %v3714_v46  ;;  %2658 = vmatprep.mubr.f32.mxu0 %v6615_v17  ;;  %v6628_v46 = vld [vmem:[#allocation10_spill] sm:$0xff]  ;;  %v6632_v24 = vand.u32 4294901760, %v6631_v42  ;;  %v6638_v17 = vld [vmem:[#allocation33_spill] sm:$0xff]  ;;  %v6654_v9 = vand.u32 4294901760, %v6539_v29  ;;  %v6664_v29 = vand.u32 4294901760, %v6547_v45  ;;  %v6676_v45 = vld [vmem:[#allocation52_spill] sm:$0xff] }
 0x138   : > { %3717 = vmatprep.subr.bf16.mxu0 %v6616_v5  ;;  %v6639_v5 = vand.u32 4294901760, %v6638_v17  ;;  %v6655_v42 = vld [vmem:[#allocation41_spill] sm:$0xff]  ;;  %v6669_v63 = vld [vmem:[#allocation2_spill] sm:$0xff]  ;;  %v6677_v53 = vand.u32 4294901760, %v6676_v45 }
 0x139   : > { %3415 = vmatpush1.bf16.msra.mxu1 %v6617_v6  ;;  %v3422_v43 = vpack.c.bf16 %v6634_v8, %v6632_v24  ;;  %v6656_v24 = vand.u32 4294901760, %v6655_v42  ;;  %v6658_v8 = vand.u32 4294901760, %v6657_v7  ;;  %v6685_v7 = vld [vmem:[#allocation59_spill] sm:$0xff] }
 0x13a   : > { %3417 = vmatprep.subr.bf16.mxu1 %v3416_v52  ;;  %2662 = vmatmul.mubr.f32.gmra.mrb[6].mxu0 %v6626_v33  ;;  %v6635_v52 = vand.u32 4294901760, %v6525_v62  ;;  %v3424_v6 = vpack.c.bf16 %v6639_v5, %v6637_v49  ;;  %v6662_v49 = vld [vmem:[#allocation45_spill] sm:$0xff] }
 0x13b   : > { %3719 = vmatpush1.bf16.msra.mxu0 %v6627_v30  ;;  %2859 = vmatprep.mubr.f32.mxu0 %v6628_v46  ;;  %v3430_v31 = vpack.c.bf16 %v6658_v8, %v6656_v24  ;;  %v6663_v17 = vand.u32 4294901760, %v6662_v49  ;;  %v6684_v24 = vld [vmem:[#allocation139_spill] sm:$0xff]  ;;  %v6686_v8 = vand.u32 4294901760, %v6685_v7 }
 0x13c   : > { %3721 = vmatprep.subr.bf16.mxu0 %v6629_v26  ;;  %1354 = vmatmul.mubr.f32.vlgmr.msra.gmra.mrb[0].mxu1 %v6630_v19  ;;  %v6652_v26 = vld [vmem:[#allocation132_spill] sm:$0xff]  ;;  %v6653_v19 = vld [vmem:[#allocation133_spill] sm:$0xff] }
 0x13d   : > { %3419 = vmatpush1.bf16.msra.mxu1 %v3418_v2  ;;  %1362 = vmatprep.mubr.f32.mxu1 %v6635_v52  ;;  %v6645_v2 = vld [vmem:[#allocation36_spill] sm:$0xff]  ;;  %v6660_v52 = vld [vmem:[#allocation43_spill] sm:$0xff] }
 0x13e   : > { %3421 = vmatprep.subr.bf16.mxu1 %v3420_v1  ;;  %v6646_v32 = vand.u32 4294901760, %v6645_v2  ;;  %v6650_v1 = vld [vmem:[#allocation39_spill] sm:$0xff]  ;;  %v6661_v57 = vand.u32 4294901760, %v6660_v52 }
 0x13f   : > { %3723 = vmatpush1.bf16.msra.mxu0 %v6640_v34  ;;  %v6651_v33 = vand.u32 4294901760, %v6650_v1 }
 0x140   : > { %3725 = vmatprep.subr.bf16.mxu0 %v6641_v25  ;;  %1366 = vmatmul.mubr.f32.gmra.mrb[2].mxu1 %v6642_v20  ;;  %v3426_v62 = vpack.c.bf16 %v6646_v32, %v6644_v37  ;;  %v3432_v5 = vpack.c.bf16 %v6663_v17, %v6661_v57  ;;  %v6667_v25 = vld [vmem:[#allocation48_spill] sm:$0xff]  ;;  %v6670_v37 = vld [vmem:[#allocation49_spill] sm:$0xff]  ;;  %v6672_v32 = vld [vmem:[#allocation51_spill] sm:$0xff] }
 0x141   : > { %3423 = vmatpush1.bf16.msra.mxu1 %v3422_v43  ;;  %1374 = vmatprep.mubr.f32.mxu1 %v6647_v61  ;;  %v3428_v30 = vpack.c.bf16 %v6651_v33, %v6649_v10  ;;  %v6659_v43 = vand.u32 4294901760, %v6541_v16  ;;  %v6668_v20 = vand.u32 4294901760, %v6667_v25  ;;  %v6671_v2 = vand.u32 4294901760, %v6670_v37  ;;  %v6678_v10 = vld [vmem:[#allocation54_spill] sm:$0xff]  ;;  %v6689_v57 = vld [vmem:[#allocation61_spill] sm:$0xff]  ;;  %v6691_v17 = vld [vmem:[#allocation63_spill] sm:$0xff] }
 0x142   : > { %3425 = vmatprep.subr.bf16.mxu1 %v3424_v6  ;;  %v6665_v6 = vld [vmem:[#allocation47_spill] sm:$0xff]  ;;  %v6679_v1 = vand.u32 4294901760, %v6678_v10  ;;  %v6690_v49 = vand.u32 4294901760, %v6689_v57  ;;  %v6696_v25 = vld [vmem:[#allocation66_spill] sm:$0xff]  ;;  %v6723_v57 = vld [vmem:[#allocation161_spill] sm:$0xff] }
 0x143   : > { %3727 = vmatpush1.bf16.msra.mxu0 %v6652_v26  ;;  %v6666_v34 = vand.u32 4294901760, %v6665_v6  ;;  %v6693_v6 = vand.u32 4294901760, %v5195_v4  ;;  %v6704_v4 = vld [vmem:[#allocation70_spill] sm:$0xff] }
 0x144   : > { %3729 = vmatprep.subr.bf16.mxu0 %v6653_v19  ;;  %1378 = vmatmul.mubr.f32.gmra.mrb[4].mxu1 %v6654_v9  ;;  %v3438_v33 = vpack.c.bf16 %v6679_v1, %v6677_v53  ;;  %v6682_v19 = vld [vmem:[#allocation57_spill] sm:$0xff]  ;;  %v6708_v10 = vld [vmem:[#allocation74_spill] sm:$0xff] }
 0x145   : > { %3427 = vmatpush1.bf16.msra.mxu1 %v3426_v62  ;;  %1386 = vmatprep.mubr.f32.mxu1 %v6659_v43  ;;  %v3434_v16 = vpack.c.bf16 %v6668_v20, %v6666_v34  ;;  %v6673_v62 = vand.u32 4294901760, %v6672_v32  ;;  %v6683_v9 = vand.u32 4294901760, %v6682_v19  ;;  %v6694_v34 = vld [vmem:[#allocation65_spill] sm:$0xff]  ;;  %v6697_v20 = vand.u32 4294901760, %v6696_v25 }
 0x146   : > { %3429 = vmatprep.subr.bf16.mxu1 %v3428_v30  ;;  %v6680_v30 = vld [vmem:[#allocation56_spill] sm:$0xff]  ;;  %v6709_v1 = vand.u32 4294901760, %v6708_v10 }
 0x147   : > { %3731 = vmatpush1.bf16.msra.mxu0 %v5325_v44  ;;  %v3436_v61 = vpack.c.bf16 %v6673_v62, %v6671_v2  ;;  %v6674_v44 = vld [vmem:[#allocation135_spill] sm:$0xff]  ;;  %v6681_v26 = vand.u32 4294901760, %v6680_v30  ;;  %v6700_v2 = vld [vmem:[#allocation69_spill] sm:$0xff] }
 0x148   : > { %3733 = vmatprep.subr.bf16.mxu0 %v5331_v39  ;;  %1390 = vmatmul.mubr.f32.gmra.mrb[6].mxu1 %v6664_v29  ;;  %v6675_v39 = vld [vmem:[#allocation137_spill] sm:$0xff]  ;;  %v6701_v32 = vand.u32 4294901760, %v6700_v2 }
 0x149   : > { %3431 = vmatpush1.bf16.msra.mxu1 %v3430_v31  ;;  %1653 = vmatprep.mubr.f32.mxu1 %v6669_v63  ;;  %v3440_v42 = vpack.c.bf16 %v6683_v9, %v6681_v26  ;;  %v6687_v31 = vld [vmem:[#allocation60_spill] sm:$0xff]  ;;  %v6712_v26 = vld [vmem:[#allocation138_spill] sm:$0xff] }
 0x14a   : > { %3433 = vmatprep.subr.bf16.mxu1 %v3432_v5  ;;  %v6688_v43 = vand.u32 4294901760, %v6687_v31  ;;  %v6692_v5 = vand.u32 4294901760, %v6691_v17  ;;  %v6698_v63 = vld [vmem:[#allocation68_spill] sm:$0xff]  ;;  %v6716_v9 = vld [vmem:[#allocation78_spill] sm:$0xff] }
 0x14b   : > { %3735 = vmatpush1.bf16.msra.mxu0 %v6674_v44  ;;  %v6699_v37 = vand.u32 4294901760, %v6698_v63  ;;  %v6705_v44 = vand.u32 4294901760, %v6704_v4  ;;  %v6726_v17 = vld [vmem:[#allocation84_spill] sm:$0xff] }
 0x14c   : > { %3737 = vmatprep.subr.bf16.mxu0 %v6675_v39  ;;  %v3442_v52 = vpack.c.bf16 %v6688_v43, %v6686_v8  ;;  %v3444_v29 = vpack.c.bf16 %v6692_v5, %v6690_v49  ;;  %v6706_v39 = vld [vmem:[#allocation72_spill] sm:$0xff]  ;;  %v6720_v8 = vld [vmem:[#allocation81_spill] sm:$0xff]  ;;  %v6727_v5 = vand.u32 4294901760, %v6726_v17 }
 0x14d   : > { %3435 = vmatpush1.bf16.msra.mxu1 %v3434_v16  ;;  %v3448_v62 = vpack.c.bf16 %v6701_v32, %v6699_v37  ;;  %v6707_v45 = vand.u32 4294901760, %v6706_v39  ;;  %v6721_v31 = vand.u32 4294901760, %v6720_v8  ;;  %v6736_v37 = vand.u32 4294901760, %v6513_v14  ;;  %v6767_v8 = vld [vmem:[#allocation4_spill] sm:$0xff]  ;;  %v6772_v17 = vld [vmem:[#allocation13_spill] sm:$0xff] }
 0x14e   : > { %3437 = vmatprep.subr.bf16.mxu1 %v3436_v61  ;;  %v6702_v61 = vand.u32 4294901760, %v4805_v28  ;;  %v6743_v14 = vand.u32 4294901760, %v4329_v48  ;;  %v6749_v39 = vand.u32 4294901760, %v4350_v21  ;;  %v6752_v48 = vld [vmem:[#allocation142_spill] sm:$0xff] }
 0x14f   : > { %3739 = vmatpush1.bf16.msra.mxu0 %v6684_v24  ;;  %v3450_v53 = vpack.c.bf16 %v6707_v45, %v6705_v44  ;;  %v6762_v21 = vld [vmem:[#allocation146_spill] sm:$0xff] }
 0x150   : > { %3741 = vmatprep.subr.bf16.mxu0 %v5361_v60  ;;  %v6695_v60 = vand.u32 4294901760, %v6694_v34  ;;  %v6730_v34 = vld [vmem:[#allocation87_spill] sm:$0xff] }
 0x151   : > { %3439 = vmatpush1.bf16.msra.mxu1 %v3438_v33  ;;  %v6710_v33 = vld [vmem:[#allocation75_spill] sm:$0xff] }
 0x152   : > { %3441 = vmatprep.subr.bf16.mxu1 %v3440_v42  ;;  %v3446_v16 = vpack.c.bf16 %v6697_v20, %v6695_v60  ;;  %v6711_v28 = vand.u32 4294901760, %v6710_v33  ;;  %v6717_v42 = vand.u32 4294901760, %v6716_v9  ;;  %v6731_v60 = vand.u32 4294901760, %v6730_v34  ;;  %v6732_v20 = vld [vmem:[#allocation152_spill] sm:$0xff] }
 0x153   : > { %3743 = vmatpush1.bf16.msra.mxu0 %v5367_v58  ;;  %v6703_v58 = vld [vmem:[#allocation9_spill] sm:$0xff] }
 0x154   : > { %2831 = vmatprep.subr.mxu0 %v6693_v6  ;;  %v3452_v30 = vpack.c.bf16 %v6711_v28, %v6709_v1  ;;  %v6757_v28 = vld [vmem:[#allocation144_spill] sm:$0xff] }
 0x155   : > { %3443 = vmatpush1.bf16.msra.mxu1 %v3442_v52  ;;  %v6722_v52 = vld [vmem:[#allocation160_spill] sm:$0xff] }
 0x156   : > { %3445 = vmatprep.subr.bf16.mxu1 %v3444_v29 }
 0x157   : > { %2835 = vmatpush1.msra.mxu0 %v6702_v61 }
 0x158   : > { %3745 = vmatprep.subr.bf16.mxu0 %v6532_v0  ;;  %2861 = vmatmul.mubr.f32.vlgmr.msra.gmra.mrb[0].mxu0 %v6703_v58  ;;  %v6713_v0 = vld [vmem:[#allocation158_spill] sm:$0xff] }
 0x159   : > { %3747 = vmatpush1.bf16.msra.mxu0 %v6534_v27  ;;  %3447 = vmatpush1.bf16.msra.mxu1 %v3446_v16  ;;  %v6714_v27 = vld [vmem:[#allocation77_spill] sm:$0xff]  ;;  %v6734_v16 = vand.u32 4294901760, %v6511_v51  ;;  %v6739_v51 = vld [vmem:[#allocation98_spill] sm:$0xff] }
 0x15a   : > { %3749 = vmatprep.subr.bf16.mxu0 %v6536_v56  ;;  %3449 = vmatprep.subr.bf16.mxu1 %v3448_v62  ;;  %v6715_v19 = vand.u32 4294901760, %v6714_v27  ;;  %v6718_v56 = vld [vmem:[#allocation79_spill] sm:$0xff] }
 0x15b   : > { %2867 = vmatprep.mubr.f32.mxu0 %v6712_v26  ;;  %v6719_v7 = vand.u32 4294901760, %v6718_v56  ;;  %v6741_v62 = vld [vmem:[#allocation99_spill] sm:$0xff] }
 0x15c   : > { %2869 = vmatmul.mubr.f32.gmra.mrb[2].mxu0 %v6713_v0  ;;  %v3454_v24 = vpack.c.bf16 %v6717_v42, %v6715_v19  ;;  %v6763_v42 = vld [vmem:[#allocation149_spill] sm:$0xff]  ;;  %v6765_v56 = vld [vmem:[#allocation3_spill] sm:$0xff] }
 0x15d   : > { %3751 = vmatpush1.bf16.msra.mxu0 %v6542_v22  ;;  %3451 = vmatpush1.bf16.msra.mxu1 %v3450_v53  ;;  %v3456_v43 = vpack.c.bf16 %v6721_v31, %v6719_v7  ;;  %v6724_v22 = vld [vmem:[#allocation83_spill] sm:$0xff]  ;;  %v6766_v7 = vld [vmem:[#allocation153_spill] sm:$0xff]  ;;  %v6768_v31 = vld [vmem:[#allocation154_spill] sm:$0xff] }
 0x15e   : > { %3753 = vmatprep.subr.bf16.mxu0 %v6544_v11  ;;  %3453 = vmatprep.subr.bf16.mxu1 %v3452_v30  ;;  %v6725_v49 = vand.u32 4294901760, %v6724_v22  ;;  %v6728_v11 = vld [vmem:[#allocation85_spill] sm:$0xff]  ;;  %v6758_v30 = vld [vmem:[#allocation110_spill] sm:$0xff]  ;;  %v6770_v22 = vld [vmem:[#allocation11_spill] sm:$0xff] }
 0x15f   : > { %2875 = vmatprep.mubr.f32.mxu0 %v6722_v52  ;;  %v6729_v6 = vand.u32 4294901760, %v6728_v11  ;;  %v6759_v27 = vand.u32 4294901760, %v6758_v30 }
 0x160   : > { %2877 = vmatmul.mubr.f32.gmra.mrb[4].mxu0 %v6723_v57  ;;  %v3458_v29 = vpack.c.bf16 %v6727_v5, %v6725_v49  ;;  %v6771_v49 = vld [vmem:[#allocation12_spill] sm:$0xff]  ;;  %v6773_v5 = vld [vmem:[#allocation14_spill] sm:$0xff] }
 0x161   : > { %3755 = vmatpush1.bf16.msra.mxu0 %v6550_v47  ;;  %3455 = vmatpush1.bf16.msra.mxu1 %v3454_v24  ;;  %v3460_v25 = vpack.c.bf16 %v6731_v60, %v6729_v6  ;;  %v6733_v47 = vand.u32 4294901760, %v6510_v3  ;;  %v6738_v3 = vand.u32 4294901760, %v6516_v35  ;;  %v6764_v24 = vld [vmem:[#allocation151_spill] sm:$0xff] }
 0x162   : > { %3757 = vmatprep.subr.bf16.mxu0 %v6552_v50  ;;  %3457 = vmatprep.subr.bf16.mxu1 %v3456_v43  ;;  %v6735_v50 = vand.u32 4294901760, %v6512_v41  ;;  %v6742_v41 = vand.u32 4294901760, %v6741_v62  ;;  %v6769_v43 = vld [vmem:[#allocation8_spill] sm:$0xff] }
 0x163   : > { %2883 = vmatprep.mubr.f32.mxu0 %v6732_v20  ;;  %v3462_v63 = vpack.c.bf16 %v6734_v16, %v6733_v47 }
 0x164   : > { %2885 = vmatmul.mubr.f32.gmra.mrb[6].mxu0 %v5191_v36  ;;  %v3464_v2 = vpack.c.bf16 %v6736_v37, %v6735_v50 }
 0x165   : > { %3759 = vmatpush1.bf16.msra.mxu0 %v6554_v18  ;;  %3459 = vmatpush1.bf16.msra.mxu1 %v3458_v29  ;;  %v6737_v18 = vand.u32 4294901760, %v6515_v13  ;;  %v6745_v13 = vld [vmem:[#allocation102_spill] sm:$0xff] }
 0x166   : > { %3761 = vmatprep.subr.bf16.mxu0 %v6556_v40  ;;  %3461 = vmatprep.subr.bf16.mxu1 %v3460_v25  ;;  %v6740_v40 = vand.u32 4294901760, %v6739_v51  ;;  %v6746_v35 = vand.u32 4294901760, %v6745_v13 }
 0x167   : > { %2998 = vmatprep.mubr.f32.mxu0 %v6628_v46  ;;  %v3466_v32 = vpack.c.bf16 %v6738_v3, %v6737_v18 }
 0x168   : > { %v3468_v61 = vpack.c.bf16 %v6742_v41, %v6740_v40 }
 0x169   : > { %3763 = vmatpush1.bf16.msra.mxu0 %v6559_v59  ;;  %3463 = vmatpush1.bf16.msra.mxu1 %v3462_v63  ;;  %v6744_v59 = vand.u32 4294901760, %v6368_v54  ;;  %v6753_v54 = vld [vmem:[#allocation107_spill] sm:$0xff] }
 0x16a   : > { %3765 = vmatprep.subr.bf16.mxu0 %v6561_v38  ;;  %3465 = vmatprep.subr.bf16.mxu1 %v3464_v2  ;;  %v6747_v38 = vld [vmem:[#allocation104_spill] sm:$0xff]  ;;  %v6754_v10 = vand.u32 4294901760, %v6753_v54 }
 0x16b   : > { %v3470_v46 = vpack.c.bf16 %v6744_v59, %v6743_v14  ;;  %v6748_v4 = vand.u32 4294901760, %v6747_v38 }
 0x16d   : > { %3767 = vmatpush1.bf16.msra.mxu0 %v6563_v55  ;;  %3467 = vmatpush1.bf16.msra.mxu1 %v3466_v32  ;;  %v3472_v44 = vpack.c.bf16 %v6748_v4, %v6746_v35  ;;  %v6750_v55 = vld [vmem:[#allocation106_spill] sm:$0xff] }
 0x16e   : > { %3769 = vmatprep.subr.bf16.mxu0 %v6565_v15  ;;  %3469 = vmatprep.subr.bf16.mxu1 %v3468_v61  ;;  %v6751_v45 = vand.u32 4294901760, %v6750_v55  ;;  %v6755_v15 = vld [vmem:[#allocation109_spill] sm:$0xff] }
 0x16f   : > { %v6756_v1 = vand.u32 4294901760, %v6755_v15 }
 0x170   : > { %v3474_v53 = vpack.c.bf16 %v6751_v45, %v6749_v39 }
 0x171   : > { %3771 = vmatpush1.bf16.msra.mxu0 %v6567_v12  ;;  %3471 = vmatpush1.bf16.msra.mxu1 %v3470_v46  ;;  %v3476_v33 = vpack.c.bf16 %v6756_v1, %v6754_v10  ;;  %v6760_v12 = vld [vmem:[#allocation112_spill] sm:$0xff] }
 0x172   : > { %3773 = vmatprep.subr.bf16.mxu0 %v6752_v48  ;;  %3473 = vmatprep.subr.bf16.mxu1 %v3472_v44  ;;  %v6761_v19 = vand.u32 4294901760, %v6760_v12 }
 0x174   : > { %v3478_v9 = vpack.c.bf16 %v6761_v19, %v6759_v27 }
 0x175   : > { %3775 = vmatpush1.bf16.msra.mxu0 %v6757_v28  ;;  %3475 = vmatpush1.bf16.msra.mxu1 %v3474_v53 }
 0x176   : > { %3777 = vmatprep.subr.bf16.mxu0 %v6762_v21  ;;  %3477 = vmatprep.subr.bf16.mxu1 %v3476_v33 }
 0x179   : > { %3779 = vmatpush1.bf16.msra.mxu0 %v6763_v42  ;;  %3479 = vmatpush1.bf16.msra.mxu1 %v3478_v9 }
 0x17a   : > { %3781 = vmatprep.subr.bf16.mxu0 %v6764_v24 }
 0x17c   : > { %1655 = vmatmul.mubr.f32.vlgmr.msra.gmra.mrb[0].mxu1 %v6765_v56 }
 0x17d   : > { %3783 = vmatpush1.bf16.msra.mxu0 %v6766_v7  ;;  %1661 = vmatprep.mubr.f32.mxu1 %v6767_v8 }
 0x17e   : > { %2972 = vmatprep.subr.mxu0 %v6768_v31 }
 0x180   : > { %1663 = vmatmul.mubr.f32.gmra.mrb[2].mxu1 %v6769_v43 }
 0x181   : > { %2974 = vmatpush1.msra.mxu0 %v6589_v23  ;;  %1669 = vmatprep.mubr.f32.mxu1 %v6770_v22  ;;  %v339_v23 = vpop.permute.xlu0 %338 }
 0x182   : > { %3000 = vmatmul.mubr.f32.vlgmr.msra.gmra.mrb[0].mxu0 %v6703_v58 }
 0x183   : > { %3006 = vmatprep.mubr.f32.mxu0 %v6712_v26 }
 0x184   : > { %1671 = vmatmul.mubr.f32.gmra.mrb[4].mxu1 %v6771_v49 }
 0x185   : > { %1677 = vmatprep.mubr.f32.mxu1 %v6772_v17  ;;  %v344_v6 = vpop.permute.xlu0 %343 }
 0x186   : > { %3008 = vmatmul.mubr.f32.gmra.mrb[2].mxu0 %v6713_v0 }
 0x187   : > { %3014 = vmatprep.mubr.f32.mxu0 %v6722_v52 }
 0x188   : > { %1679 = vmatmul.mubr.f32.gmra.mrb[6].mxu1 %v6773_v5 }
 0x18a   : > { %3016 = vmatmul.mubr.f32.gmra.mrb[4].mxu0 %v6723_v57 }
 0x18b   : > { %3022 = vmatprep.mubr.f32.mxu0 %v6732_v20 }
 0x18d   : > { %v349_v63 = vpop.permute.xlu1 %348 }
 0x18e   : > { %3024 = vmatmul.mubr.f32.gmra.mrb[6].mxu0 %v5191_v36 }
 0x191   : > { %v354_v35 = vpop.permute.xlu1 %353 }
 0x24f   : > { %v1656_v58 = vpop.f32.mrb[0].mxu1 }
 0x250   : > { %v1658_v26 = vpop.f32.mrb[1].mxu1  ;;  %v3784_v29 = vadd.f32 %v1656_v58, %v339_v23 }
 0x251   : > { %v3786_v11 = vadd.f32 %v1658_v26, %v339_v23 }
 0x253   : > { %v1664_v34 = vpop.f32.mrb[2].mxu1 }
 0x254   : > { %v1666_v60 = vpop.f32.mrb[3].mxu1  ;;  %v3788_v47 = vadd.f32 %v1664_v34, %v344_v6 }
 0x255   : > { %v3001_v25 = vpop.f32.mrb[0].mxu0  ;;  %v3790_v57 = vadd.f32 %v1666_v60, %v344_v6 }
 0x256   : > { %v3003_v0 = vpop.f32.mrb[1].mxu0  ;;  %v3785_v52 = vadd.f32 %v3784_v29, %v3001_v25 }
 0x257   : > { %v3787_v16 = vadd.f32 %v3786_v11, %v3003_v0  ;;  %v1672_v50 = vpop.f32.mrb[4].mxu1 }
 0x258   : > { %vm3030_vm2 = vcmp.gt.f32.partialorder %v3785_v52, 0.0  ;;  %v3038_v36 = vmul.f32 0.5, %v3785_v52  ;;  %v1674_v20 = vpop.f32.mrb[5].mxu1  ;;  %v3792_v51 = vadd.f32 %v1672_v50, %v349_v63 }
 0x259   : > { %v3009_v37 = vpop.f32.mrb[2].mxu0  ;;  %vm3031_vm3 = vcmp.gt.f32.partialorder %v3787_v16, 0.0  ;;  %v3039_v2 = vmul.f32 0.5, %v3787_v16  ;;  %v3794_v41 = vadd.f32 %v1674_v20, %v349_v63 }
 0x25a   : > { %v3046_v18 = vsel %vm3030_vm2, %v3785_v52, %v3038_v36  ;;  %v3011_v3 = vpop.f32.mrb[3].mxu0  ;;  %v3789_v32 = vadd.f32 %v3788_v47, %v3009_v37 }
 0x25b   : > { %3054 = vst [vmem:[%s5745_s25] sm:$0xff] %v3046_v18  ;;  %v3047_v40 = vsel %vm3031_vm3, %v3787_v16, %v3039_v2  ;;  %v3791_v62 = vadd.f32 %v3790_v57, %v3011_v3  ;;  %v1680_v61 = vpop.f32.mrb[6].mxu1 }
 0x25c   : > { %3055 = vst [vmem:[%s5745_s25 + $0x8] sm:$0xff] %v3047_v40  ;;  %vm3032_vm4 = vcmp.gt.f32.partialorder %v3789_v32, 0.0  ;;  %v3040_v14 = vmul.f32 0.5, %v3789_v32  ;;  %v1682_v59 = vpop.f32.mrb[7].mxu1  ;;  %v3796_v39 = vadd.f32 %v1680_v61, %v354_v35 }
 0x25d   : > { %v3017_v46 = vpop.f32.mrb[4].mxu0  ;;  %vm3033_vm5 = vcmp.gt.f32.partialorder %v3791_v62, 0.0  ;;  %v3041_v13 = vmul.f32 0.5, %v3791_v62  ;;  %v3798_v53 = vadd.f32 %v1682_v59, %v354_v35 }
 0x25e   : > { %v3048_v38 = vsel %vm3032_vm4, %v3789_v32, %v3040_v14  ;;  %v3019_v4 = vpop.f32.mrb[5].mxu0  ;;  %v3793_v44 = vadd.f32 %v3792_v51, %v3017_v46 }
 0x25f   : > { %3056 = vst [vmem:[%s5745_s25 + $0x10] sm:$0xff] %v3048_v38  ;;  %v3049_v55 = vsel %vm3033_vm5, %v3791_v62, %v3041_v13  ;;  %v3795_v45 = vadd.f32 %v3794_v41, %v3019_v4 }
 0x260   : > { %3057 = vst [vmem:[%s5745_s25 + $0x18] sm:$0xff] %v3049_v55  ;;  %vm3034_vm6 = vcmp.gt.f32.partialorder %v3793_v44, 0.0  ;;  %v3042_v48 = vmul.f32 0.5, %v3793_v44 }
 0x261   : > { %v3025_v54 = vpop.f32.mrb[6].mxu0  ;;  %vm3035_vm7 = vcmp.gt.f32.partialorder %v3795_v45, 0.0  ;;  %v3043_v10 = vmul.f32 0.5, %v3795_v45 }
 0x262   : > { %v3050_v15 = vsel %vm3034_vm6, %v3793_v44, %v3042_v48  ;;  %v3027_v1 = vpop.f32.mrb[7].mxu0  ;;  %v3797_v33 = vadd.f32 %v3796_v39, %v3025_v54 }
 0x263   : > { %3058 = vst [vmem:[%s5745_s25 + $0x20] sm:$0xff] %v3050_v15  ;;  %v3051_v28 = vsel %vm3035_vm7, %v3795_v45, %v3043_v10  ;;  %v3799_v30 = vadd.f32 %v3798_v53, %v3027_v1 }
 0x264   : > { %3059 = vst [vmem:[%s5745_s25 + $0x28] sm:$0xff] %v3051_v28  ;;  %vm3036_vm8 = vcmp.gt.f32.partialorder %v3797_v33, 0.0  ;;  %v3044_v27 = vmul.f32 0.5, %v3797_v33 }
 0x265   : > { %vm3037_vm9 = vcmp.gt.f32.partialorder %v3799_v30, 0.0  ;;  %v3045_v12 = vmul.f32 0.5, %v3799_v30 }
 0x266   : > { %v3052_v19 = vsel %vm3036_vm8, %v3797_v33, %v3044_v27 }
 0x267   : > { %3060 = vst [vmem:[%s5745_s25 + $0x30] sm:$0xf] %v3052_v19  ;;  %v3053_v9 = vsel %vm3037_vm9, %v3799_v30, %v3045_v12 }
 0x268   : > { %3061 = vst [vmem:[%s5745_s25 + $0x38] sm:$0xf] %v3053_v9 }
 0x269 PF: > { %s13_s14 = sadd.s32 1, %s3934_s14   ;;  %s6774_s12 = smov %s3930_s13 }
 0x26a   : > { %p10_p5 = scmp.ge.s32.totalorder %s13_s14, 4   ;;  %s6775_s13 = smov %s6777_s15 }
 0x26c   :  { %12 = sbr.rel (!%p10_p5) target bundleno = 2 (0x2), region = 62 }

</bundles_post_ra>
